<compile_context>
chip_gen: v7x
topology: tpu7x:2x2x1
jax: 0.10.0
libtpu: 0.0.40
codegen_flags: <defaults>
</compile_context>

<pallas_src>
import jax
import jax.numpy as jnp
from jax import lax
from jax.experimental import pallas as pl
from jax.experimental.pallas import tpu as pltpu

B, CIN, H, W = 2, 3, 32, 32        # module implies 3 input channels, 32x32 spatial
COUT, K = 16, 3
PH, PW = H // 2, W // 2            # 16, 16
NPIX = H * W                       # 1024
NPOOL = PH * PW                    # 256
KK = K * K * CIN                   # 27
NCLS = 10
NPAD = 128                         # FC output padded to one full lane width


def fused_cnn_kernel(pt_ref, wc_ref, cb_ref, fw_ref, fb_ref, o_ref):
    # pt_ref: (1, 27, 1024)  im2col patches (transposed); lanes = (q, ph, pw)
    # wc_ref: (16, 27)       conv weights, rows = out channel
    # cb_ref: (16, 1)        conv bias
    # fw_ref: (16, 256, 128) FC weights (chan, pooled pixel, padded class)
    # fb_ref: (1, 128)       FC bias (padded)
    # o_ref : (1, 1, 128)    padded logits for this image
    patches = pt_ref[0]                                           # (27, 1024)
    y = jnp.dot(wc_ref[...], patches,
                preferred_element_type=jnp.float32)               # (16, 1024)
    y = jnp.maximum(y + cb_ref[...], 0.0)                         # bias + ReLU
    # 2x2 max-pool: lanes ordered (q, ph, pw), q = 2*hb + wb, so the four
    # window members are four contiguous 256-lane chunks.
    pooled = jnp.maximum(
        jnp.maximum(y[:, 0 * NPOOL:1 * NPOOL], y[:, 1 * NPOOL:2 * NPOOL]),
        jnp.maximum(y[:, 2 * NPOOL:3 * NPOOL], y[:, 3 * NPOOL:4 * NPOOL]))
    # Linear(4096 -> 10): one (1,256)x(256,128) matmul per conv channel,
    # accumulated in f32 (channel c of `pooled` pairs with fw_ref[c]).
    acc = fb_ref[...]                                             # (1, 128)
    for c in range(COUT):                                         # static unroll
        acc = acc + jnp.dot(pooled[c:c + 1, :], fw_ref[c],
                            preferred_element_type=jnp.float32)
    o_ref[0] = acc                                                # lane-dense store


def simple_cnn_forward(x, conv_w, conv_b, fc_w, fc_b):
    b = x.shape[0]
    # --- tiny wrapper glue: pad + pool-friendly transposed im2col ---
    x_pad = jnp.pad(x, ((0, 0), (0, 0), (1, 1), (1, 1)))          # (b, 3, 34, 34)
    slabs = []
    for kh in range(K):
        for kw in range(K):
            win = x_pad[:, :, kh:kh + H, kw:kw + W]               # (b, ci, h, w)
            win = win.reshape(b, CIN, PH, 2, PW, 2)               # (b,ci,ph,hb,pw,wb)
            win = win.transpose(0, 1, 3, 5, 2, 4)                 # (b,ci,hb,wb,ph,pw)
            slabs.append(win.reshape(b, CIN, NPIX))
    patches_t = jnp.stack(slabs, axis=1).reshape(b, KK, NPIX)     # rows = (kh,kw,ci)

    # conv weight (O, I, KH, KW) -> (O, (kh, kw, ci))
    wc = jnp.transpose(conv_w, (0, 2, 3, 1)).reshape(COUT, KK)
    cb = conv_b.reshape(COUT, 1)

    # fc weight (N, c*256 + ph*16 + pw) -> (c, ph*16 + pw, N padded to 128)
    fw = jnp.transpose(fc_w.reshape(NCLS, COUT, NPOOL), (1, 2, 0))
    fw = jnp.pad(fw, ((0, 0), (0, 0), (0, NPAD - NCLS)))          # (16, 256, 128)
    fb = jnp.pad(fc_b, (0, NPAD - NCLS)).reshape(1, NPAD)

    out = pl.pallas_call(
        fused_cnn_kernel,
        out_shape=jax.ShapeDtypeStruct((b, 1, NPAD), jnp.float32),
        grid=(b,),
        in_specs=[
            pl.BlockSpec((1, KK, NPIX), lambda i: (i, 0, 0)),
            pl.BlockSpec((COUT, KK), lambda i: (0, 0)),
            pl.BlockSpec((COUT, 1), lambda i: (0, 0)),
            pl.BlockSpec((COUT, NPOOL, NPAD), lambda i: (0, 0, 0)),
            pl.BlockSpec((1, NPAD), lambda i: (0, 0)),
        ],
        out_specs=pl.BlockSpec((1, 1, NPAD), lambda i: (i, 0, 0)),
        compiler_params=pltpu.CompilerParams(dimension_semantics=("parallel",)),
    )(patches_t, wc, cb, fw, fb)

    return out[:, 0, :NCLS]


simple_cnn_forward = jax.jit(simple_cnn_forward)


if __name__ == "__main__":
    key = jax.random.PRNGKey(0)
    k1, k2, k3, k4, kx = jax.random.split(key, 5)
    conv_w = 0.1 * jax.random.normal(k1, (COUT, CIN, K, K), jnp.float32)
    conv_b = 0.1 * jax.random.normal(k2, (COUT,), jnp.float32)
    fc_w = 0.05 * jax.random.normal(k3, (NCLS, COUT * PH * PW), jnp.float32)
    fc_b = 0.05 * jax.random.normal(k4, (NCLS,), jnp.float32)
    x = jax.random.normal(kx, (B, CIN, H, W), jnp.float32)        # NCHW, like PyTorch

    out = jax.block_until_ready(simple_cnn_forward(x, conv_w, conv_b, fc_w, fc_b))

    # pure-JAX NCHW reference (PyTorch semantics)
    ref = lax.conv_general_dilated(x, conv_w, (1, 1), ((1, 1), (1, 1)),
                                   dimension_numbers=("NCHW", "OIHW", "NCHW"))
    ref = jnp.maximum(ref + conv_b.reshape(1, COUT, 1, 1), 0.0)
    ref = lax.reduce_window(ref, -jnp.inf, lax.max, (1, 1, 2, 2), (1, 1, 2, 2), "VALID")
    ref = ref.reshape(B, COUT * PH * PW) @ fc_w.T + fc_b

    assert out.shape == (B, NCLS), out.shape
    err = float(jnp.max(jnp.abs(out - ref)))
    assert jnp.allclose(out, ref, atol=2e-3, rtol=2e-3), err
    print("KERNEL_OK")
</pallas_src>

<mosaic_0001>
module attributes {stable_mosaic.version = 11 : i64} {
  func.func @fused_cnn_kernel(%arg0: i32, %arg1: memref<1x27x1024xf32, #tpu.memory_space<vmem>>, %arg2: memref<16x27xf32, #tpu.memory_space<vmem>>, %arg3: memref<16x1xf32, #tpu.memory_space<vmem>>, %arg4: memref<16x256x128xf32, #tpu.memory_space<vmem>>, %arg5: memref<1x128xf32, #tpu.memory_space<vmem>>, %arg6: memref<1x1x128xf32, #tpu.memory_space<vmem>>) attributes {dimension_semantics = [#tpu.dimension_semantics<parallel>], iteration_bounds = array<i64: 2>, scalar_prefetch = 0 : i64, scratch_operands = 0 : i64, tpu.core_type = #tpu.core_type<tc>, window_params = [{transform_indices = @transform_0, window_bounds = array<i64: 1, 27, 1024>}, {pipeline_mode = #tpu.pipeline_mode<synchronous>, transform_indices = @transform_1, window_bounds = array<i64: 16, 27>}, {pipeline_mode = #tpu.pipeline_mode<synchronous>, transform_indices = @transform_2, window_bounds = array<i64: 16, 1>}, {pipeline_mode = #tpu.pipeline_mode<synchronous>, transform_indices = @transform_3, window_bounds = array<i64: 16, 256, 128>}, {pipeline_mode = #tpu.pipeline_mode<synchronous>, transform_indices = @transform_4, window_bounds = array<i64: 1, 128>}, {transform_indices = @transform_5, window_bounds = array<i64: 1, 1, 128>}]} {
    %c0 = arith.constant 0 : index
    %c0_0 = arith.constant 0 : index
    %c0_1 = arith.constant 0 : index
    %0 = vector.load %arg1[%c0, %c0_0, %c0_1] : memref<1x27x1024xf32, #tpu.memory_space<vmem>>, vector<1x27x1024xf32>
    %1 = vector.shape_cast %0 : vector<1x27x1024xf32> to vector<27x1024xf32>
    %c0_2 = arith.constant 0 : index
    %c0_3 = arith.constant 0 : index
    %2 = vector.load %arg2[%c0_2, %c0_3] : memref<16x27xf32, #tpu.memory_space<vmem>>, vector<16x27xf32>
    %cst = arith.constant dense<0.000000e+00> : vector<16x1024xf32>
    %3 = tpu.matmul %2, %1, %cst {dimension_numbers = #tpu.dot_dimension_numbers<[1], [0], [0], [1], [0, 0, 1, 1], [], []>} : vector<16x27xf32>, vector<27x1024xf32>, vector<16x1024xf32> -> vector<16x1024xf32>
    %c0_4 = arith.constant 0 : index
    %c0_5 = arith.constant 0 : index
    %4 = vector.load %arg3[%c0_4, %c0_5] : memref<16x1xf32, #tpu.memory_space<vmem>>, vector<16x1xf32>
    %5 = vector.broadcast %4 : vector<16x1xf32> to vector<16x1024xf32>
    %6 = arith.addf %3, %5 : vector<16x1024xf32>
    %cst_6 = arith.constant 0.000000e+00 : f32
    %7 = vector.broadcast %cst_6 : f32 to vector<16x1024xf32>
    %8 = arith.maximumf %6, %7 : vector<16x1024xf32>
    %9 = vector.extract_strided_slice %8 {offsets = [0, 0], sizes = [16, 256], strides = [1, 1]} : vector<16x1024xf32> to vector<16x256xf32>
    %10 = vector.extract_strided_slice %8 {offsets = [0, 256], sizes = [16, 256], strides = [1, 1]} : vector<16x1024xf32> to vector<16x256xf32>
    %11 = arith.maximumf %9, %10 : vector<16x256xf32>
    %12 = vector.extract_strided_slice %8 {offsets = [0, 512], sizes = [16, 256], strides = [1, 1]} : vector<16x1024xf32> to vector<16x256xf32>
    %13 = vector.extract_strided_slice %8 {offsets = [0, 768], sizes = [16, 256], strides = [1, 1]} : vector<16x1024xf32> to vector<16x256xf32>
    %14 = arith.maximumf %12, %13 : vector<16x256xf32>
    %15 = arith.maximumf %11, %14 : vector<16x256xf32>
    %c0_7 = arith.constant 0 : index
    %c0_8 = arith.constant 0 : index
    %16 = vector.load %arg5[%c0_7, %c0_8] : memref<1x128xf32, #tpu.memory_space<vmem>>, vector<1x128xf32>
    %17 = vector.extract_strided_slice %15 {offsets = [0, 0], sizes = [1, 256], strides = [1, 1]} : vector<16x256xf32> to vector<1x256xf32>
    %c0_9 = arith.constant 0 : index
    %c0_10 = arith.constant 0 : index
    %c0_11 = arith.constant 0 : index
    %18 = vector.load %arg4[%c0_9, %c0_10, %c0_11] : memref<16x256x128xf32, #tpu.memory_space<vmem>>, vector<1x256x128xf32>
    %19 = vector.shape_cast %18 : vector<1x256x128xf32> to vector<256x128xf32>
    %cst_12 = arith.constant dense<0.000000e+00> : vector<1x128xf32>
    %20 = tpu.matmul %17, %19, %cst_12 {dimension_numbers = #tpu.dot_dimension_numbers<[1], [0], [0], [1], [0, 0, 1, 1], [], []>} : vector<1x256xf32>, vector<256x128xf32>, vector<1x128xf32> -> vector<1x128xf32>
    %21 = arith.addf %16, %20 : vector<1x128xf32>
    %22 = vector.extract_strided_slice %15 {offsets = [1, 0], sizes = [1, 256], strides = [1, 1]} : vector<16x256xf32> to vector<1x256xf32>
    %c1 = arith.constant 1 : index
    %c0_13 = arith.constant 0 : index
    %c0_14 = arith.constant 0 : index
    %23 = vector.load %arg4[%c1, %c0_13, %c0_14] : memref<16x256x128xf32, #tpu.memory_space<vmem>>, vector<1x256x128xf32>
    %24 = vector.shape_cast %23 : vector<1x256x128xf32> to vector<256x128xf32>
    %cst_15 = arith.constant dense<0.000000e+00> : vector<1x128xf32>
    %25 = tpu.matmul %22, %24, %cst_15 {dimension_numbers = #tpu.dot_dimension_numbers<[1], [0], [0], [1], [0, 0, 1, 1], [], []>} : vector<1x256xf32>, vector<256x128xf32>, vector<1x128xf32> -> vector<1x128xf32>
    %26 = arith.addf %21, %25 : vector<1x128xf32>
    %27 = vector.extract_strided_slice %15 {offsets = [2, 0], sizes = [1, 256], strides = [1, 1]} : vector<16x256xf32> to vector<1x256xf32>
    %c2 = arith.constant 2 : index
    %c0_16 = arith.constant 0 : index
    %c0_17 = arith.constant 0 : index
    %28 = vector.load %arg4[%c2, %c0_16, %c0_17] : memref<16x256x128xf32, #tpu.memory_space<vmem>>, vector<1x256x128xf32>
    %29 = vector.shape_cast %28 : vector<1x256x128xf32> to vector<256x128xf32>
    %cst_18 = arith.constant dense<0.000000e+00> : vector<1x128xf32>
    %30 = tpu.matmul %27, %29, %cst_18 {dimension_numbers = #tpu.dot_dimension_numbers<[1], [0], [0], [1], [0, 0, 1, 1], [], []>} : vector<1x256xf32>, vector<256x128xf32>, vector<1x128xf32> -> vector<1x128xf32>
    %31 = arith.addf %26, %30 : vector<1x128xf32>
    %32 = vector.extract_strided_slice %15 {offsets = [3, 0], sizes = [1, 256], strides = [1, 1]} : vector<16x256xf32> to vector<1x256xf32>
    %c3 = arith.constant 3 : index
    %c0_19 = arith.constant 0 : index
    %c0_20 = arith.constant 0 : index
    %33 = vector.load %arg4[%c3, %c0_19, %c0_20] : memref<16x256x128xf32, #tpu.memory_space<vmem>>, vector<1x256x128xf32>
    %34 = vector.shape_cast %33 : vector<1x256x128xf32> to vector<256x128xf32>
    %cst_21 = arith.constant dense<0.000000e+00> : vector<1x128xf32>
    %35 = tpu.matmul %32, %34, %cst_21 {dimension_numbers = #tpu.dot_dimension_numbers<[1], [0], [0], [1], [0, 0, 1, 1], [], []>} : vector<1x256xf32>, vector<256x128xf32>, vector<1x128xf32> -> vector<1x128xf32>
    %36 = arith.addf %31, %35 : vector<1x128xf32>
    %37 = vector.extract_strided_slice %15 {offsets = [4, 0], sizes = [1, 256], strides = [1, 1]} : vector<16x256xf32> to vector<1x256xf32>
    %c4 = arith.constant 4 : index
    %c0_22 = arith.constant 0 : index
    %c0_23 = arith.constant 0 : index
    %38 = vector.load %arg4[%c4, %c0_22, %c0_23] : memref<16x256x128xf32, #tpu.memory_space<vmem>>, vector<1x256x128xf32>
    %39 = vector.shape_cast %38 : vector<1x256x128xf32> to vector<256x128xf32>
    %cst_24 = arith.constant dense<0.000000e+00> : vector<1x128xf32>
    %40 = tpu.matmul %37, %39, %cst_24 {dimension_numbers = #tpu.dot_dimension_numbers<[1], [0], [0], [1], [0, 0, 1, 1], [], []>} : vector<1x256xf32>, vector<256x128xf32>, vector<1x128xf32> -> vector<1x128xf32>
    %41 = arith.addf %36, %40 : vector<1x128xf32>
    %42 = vector.extract_strided_slice %15 {offsets = [5, 0], sizes = [1, 256], strides = [1, 1]} : vector<16x256xf32> to vector<1x256xf32>
    %c5 = arith.constant 5 : index
    %c0_25 = arith.constant 0 : index
    %c0_26 = arith.constant 0 : index
    %43 = vector.load %arg4[%c5, %c0_25, %c0_26] : memref<16x256x128xf32, #tpu.memory_space<vmem>>, vector<1x256x128xf32>
    %44 = vector.shape_cast %43 : vector<1x256x128xf32> to vector<256x128xf32>
    %cst_27 = arith.constant dense<0.000000e+00> : vector<1x128xf32>
    %45 = tpu.matmul %42, %44, %cst_27 {dimension_numbers = #tpu.dot_dimension_numbers<[1], [0], [0], [1], [0, 0, 1, 1], [], []>} : vector<1x256xf32>, vector<256x128xf32>, vector<1x128xf32> -> vector<1x128xf32>
    %46 = arith.addf %41, %45 : vector<1x128xf32>
    %47 = vector.extract_strided_slice %15 {offsets = [6, 0], sizes = [1, 256], strides = [1, 1]} : vector<16x256xf32> to vector<1x256xf32>
    %c6 = arith.constant 6 : index
    %c0_28 = arith.constant 0 : index
    %c0_29 = arith.constant 0 : index
    %48 = vector.load %arg4[%c6, %c0_28, %c0_29] : memref<16x256x128xf32, #tpu.memory_space<vmem>>, vector<1x256x128xf32>
    %49 = vector.shape_cast %48 : vector<1x256x128xf32> to vector<256x128xf32>
    %cst_30 = arith.constant dense<0.000000e+00> : vector<1x128xf32>
    %50 = tpu.matmul %47, %49, %cst_30 {dimension_numbers = #tpu.dot_dimension_numbers<[1], [0], [0], [1], [0, 0, 1, 1], [], []>} : vector<1x256xf32>, vector<256x128xf32>, vector<1x128xf32> -> vector<1x128xf32>
    %51 = arith.addf %46, %50 : vector<1x128xf32>
    %52 = vector.extract_strided_slice %15 {offsets = [7, 0], sizes = [1, 256], strides = [1, 1]} : vector<16x256xf32> to vector<1x256xf32>
    %c7 = arith.constant 7 : index
    %c0_31 = arith.constant 0 : index
    %c0_32 = arith.constant 0 : index
    %53 = vector.load %arg4[%c7, %c0_31, %c0_32] : memref<16x256x128xf32, #tpu.memory_space<vmem>>, vector<1x256x128xf32>
    %54 = vector.shape_cast %53 : vector<1x256x128xf32> to vector<256x128xf32>
    %cst_33 = arith.constant dense<0.000000e+00> : vector<1x128xf32>
    %55 = tpu.matmul %52, %54, %cst_33 {dimension_numbers = #tpu.dot_dimension_numbers<[1], [0], [0], [1], [0, 0, 1, 1], [], []>} : vector<1x256xf32>, vector<256x128xf32>, vector<1x128xf32> -> vector<1x128xf32>
    %56 = arith.addf %51, %55 : vector<1x128xf32>
    %57 = vector.extract_strided_slice %15 {offsets = [8, 0], sizes = [1, 256], strides = [1, 1]} : vector<16x256xf32> to vector<1x256xf32>
    %c8 = arith.constant 8 : index
    %c0_34 = arith.constant 0 : index
    %c0_35 = arith.constant 0 : index
    %58 = vector.load %arg4[%c8, %c0_34, %c0_35] : memref<16x256x128xf32, #tpu.memory_space<vmem>>, vector<1x256x128xf32>
    %59 = vector.shape_cast %58 : vector<1x256x128xf32> to vector<256x128xf32>
    %cst_36 = arith.constant dense<0.000000e+00> : vector<1x128xf32>
    %60 = tpu.matmul %57, %59, %cst_36 {dimension_numbers = #tpu.dot_dimension_numbers<[1], [0], [0], [1], [0, 0, 1, 1], [], []>} : vector<1x256xf32>, vector<256x128xf32>, vector<1x128xf32> -> vector<1x128xf32>
    %61 = arith.addf %56, %60 : vector<1x128xf32>
    %62 = vector.extract_strided_slice %15 {offsets = [9, 0], sizes = [1, 256], strides = [1, 1]} : vector<16x256xf32> to vector<1x256xf32>
    %c9 = arith.constant 9 : index
    %c0_37 = arith.constant 0 : index
    %c0_38 = arith.constant 0 : index
    %63 = vector.load %arg4[%c9, %c0_37, %c0_38] : memref<16x256x128xf32, #tpu.memory_space<vmem>>, vector<1x256x128xf32>
    %64 = vector.shape_cast %63 : vector<1x256x128xf32> to vector<256x128xf32>
    %cst_39 = arith.constant dense<0.000000e+00> : vector<1x128xf32>
    %65 = tpu.matmul %62, %64, %cst_39 {dimension_numbers = #tpu.dot_dimension_numbers<[1], [0], [0], [1], [0, 0, 1, 1], [], []>} : vector<1x256xf32>, vector<256x128xf32>, vector<1x128xf32> -> vector<1x128xf32>
    %66 = arith.addf %61, %65 : vector<1x128xf32>
    %67 = vector.extract_strided_slice %15 {offsets = [10, 0], sizes = [1, 256], strides = [1, 1]} : vector<16x256xf32> to vector<1x256xf32>
    %c10 = arith.constant 10 : index
    %c0_40 = arith.constant 0 : index
    %c0_41 = arith.constant 0 : index
    %68 = vector.load %arg4[%c10, %c0_40, %c0_41] : memref<16x256x128xf32, #tpu.memory_space<vmem>>, vector<1x256x128xf32>
    %69 = vector.shape_cast %68 : vector<1x256x128xf32> to vector<256x128xf32>
    %cst_42 = arith.constant dense<0.000000e+00> : vector<1x128xf32>
    %70 = tpu.matmul %67, %69, %cst_42 {dimension_numbers = #tpu.dot_dimension_numbers<[1], [0], [0], [1], [0, 0, 1, 1], [], []>} : vector<1x256xf32>, vector<256x128xf32>, vector<1x128xf32> -> vector<1x128xf32>
    %71 = arith.addf %66, %70 : vector<1x128xf32>
    %72 = vector.extract_strided_slice %15 {offsets = [11, 0], sizes = [1, 256], strides = [1, 1]} : vector<16x256xf32> to vector<1x256xf32>
    %c11 = arith.constant 11 : index
    %c0_43 = arith.constant 0 : index
    %c0_44 = arith.constant 0 : index
    %73 = vector.load %arg4[%c11, %c0_43, %c0_44] : memref<16x256x128xf32, #tpu.memory_space<vmem>>, vector<1x256x128xf32>
    %74 = vector.shape_cast %73 : vector<1x256x128xf32> to vector<256x128xf32>
    %cst_45 = arith.constant dense<0.000000e+00> : vector<1x128xf32>
    %75 = tpu.matmul %72, %74, %cst_45 {dimension_numbers = #tpu.dot_dimension_numbers<[1], [0], [0], [1], [0, 0, 1, 1], [], []>} : vector<1x256xf32>, vector<256x128xf32>, vector<1x128xf32> -> vector<1x128xf32>
    %76 = arith.addf %71, %75 : vector<1x128xf32>
    %77 = vector.extract_strided_slice %15 {offsets = [12, 0], sizes = [1, 256], strides = [1, 1]} : vector<16x256xf32> to vector<1x256xf32>
    %c12 = arith.constant 12 : index
    %c0_46 = arith.constant 0 : index
    %c0_47 = arith.constant 0 : index
    %78 = vector.load %arg4[%c12, %c0_46, %c0_47] : memref<16x256x128xf32, #tpu.memory_space<vmem>>, vector<1x256x128xf32>
    %79 = vector.shape_cast %78 : vector<1x256x128xf32> to vector<256x128xf32>
    %cst_48 = arith.constant dense<0.000000e+00> : vector<1x128xf32>
    %80 = tpu.matmul %77, %79, %cst_48 {dimension_numbers = #tpu.dot_dimension_numbers<[1], [0], [0], [1], [0, 0, 1, 1], [], []>} : vector<1x256xf32>, vector<256x128xf32>, vector<1x128xf32> -> vector<1x128xf32>
    %81 = arith.addf %76, %80 : vector<1x128xf32>
    %82 = vector.extract_strided_slice %15 {offsets = [13, 0], sizes = [1, 256], strides = [1, 1]} : vector<16x256xf32> to vector<1x256xf32>
    %c13 = arith.constant 13 : index
    %c0_49 = arith.constant 0 : index
    %c0_50 = arith.constant 0 : index
    %83 = vector.load %arg4[%c13, %c0_49, %c0_50] : memref<16x256x128xf32, #tpu.memory_space<vmem>>, vector<1x256x128xf32>
    %84 = vector.shape_cast %83 : vector<1x256x128xf32> to vector<256x128xf32>
    %cst_51 = arith.constant dense<0.000000e+00> : vector<1x128xf32>
    %85 = tpu.matmul %82, %84, %cst_51 {dimension_numbers = #tpu.dot_dimension_numbers<[1], [0], [0], [1], [0, 0, 1, 1], [], []>} : vector<1x256xf32>, vector<256x128xf32>, vector<1x128xf32> -> vector<1x128xf32>
    %86 = arith.addf %81, %85 : vector<1x128xf32>
    %87 = vector.extract_strided_slice %15 {offsets = [14, 0], sizes = [1, 256], strides = [1, 1]} : vector<16x256xf32> to vector<1x256xf32>
    %c14 = arith.constant 14 : index
    %c0_52 = arith.constant 0 : index
    %c0_53 = arith.constant 0 : index
    %88 = vector.load %arg4[%c14, %c0_52, %c0_53] : memref<16x256x128xf32, #tpu.memory_space<vmem>>, vector<1x256x128xf32>
    %89 = vector.shape_cast %88 : vector<1x256x128xf32> to vector<256x128xf32>
    %cst_54 = arith.constant dense<0.000000e+00> : vector<1x128xf32>
    %90 = tpu.matmul %87, %89, %cst_54 {dimension_numbers = #tpu.dot_dimension_numbers<[1], [0], [0], [1], [0, 0, 1, 1], [], []>} : vector<1x256xf32>, vector<256x128xf32>, vector<1x128xf32> -> vector<1x128xf32>
    %91 = arith.addf %86, %90 : vector<1x128xf32>
    %92 = vector.extract_strided_slice %15 {offsets = [15, 0], sizes = [1, 256], strides = [1, 1]} : vector<16x256xf32> to vector<1x256xf32>
    %c15 = arith.constant 15 : index
    %c0_55 = arith.constant 0 : index
    %c0_56 = arith.constant 0 : index
    %93 = vector.load %arg4[%c15, %c0_55, %c0_56] : memref<16x256x128xf32, #tpu.memory_space<vmem>>, vector<1x256x128xf32>
    %94 = vector.shape_cast %93 : vector<1x256x128xf32> to vector<256x128xf32>
    %cst_57 = arith.constant dense<0.000000e+00> : vector<1x128xf32>
    %95 = tpu.matmul %92, %94, %cst_57 {dimension_numbers = #tpu.dot_dimension_numbers<[1], [0], [0], [1], [0, 0, 1, 1], [], []>} : vector<1x256xf32>, vector<256x128xf32>, vector<1x128xf32> -> vector<1x128xf32>
    %96 = arith.addf %91, %95 : vector<1x128xf32>
    %c0_58 = arith.constant 0 : index
    %c0_59 = arith.constant 0 : index
    %c0_60 = arith.constant 0 : index
    %97 = vector.load %arg6[%c0_58, %c0_59, %c0_60] : memref<1x1x128xf32, #tpu.memory_space<vmem>>, vector<1x1x128xf32>
    %98 = vector.shape_cast %97 : vector<1x1x128xf32> to vector<1x128xf32>
    %99 = vector.shape_cast %96 : vector<1x128xf32> to vector<1x1x128xf32>
    tpu.vector_store %arg6[%c0_58, %c0_59, %c0_60], %99 {strides = array<i32>} : memref<1x1x128xf32, #tpu.memory_space<vmem>>, vector<1x1x128xf32>,
    return
  }
  func.func @transform_0(%arg0: i32) -> (i32, i32, i32) {
    %c0_i32 = arith.constant 0 : i32
    %c0_i32_0 = arith.constant 0 : i32
    %c0_i32_1 = arith.constant 0 : i32
    return %arg0, %c0_i32, %c0_i32_0 : i32, i32, i32
  }
  func.func @transform_1(%arg0: i32) -> (i32, i32) {
    %c0_i32 = arith.constant 0 : i32
    %c0_i32_0 = arith.constant 0 : i32
    %c0_i32_1 = arith.constant 0 : i32
    return %c0_i32, %c0_i32_0 : i32, i32
  }
  func.func @transform_2(%arg0: i32) -> (i32, i32) {
    %c0_i32 = arith.constant 0 : i32
    %c0_i32_0 = arith.constant 0 : i32
    %c0_i32_1 = arith.constant 0 : i32
    return %c0_i32, %c0_i32_0 : i32, i32
  }
  func.func @transform_3(%arg0: i32) -> (i32, i32, i32) {
    %c0_i32 = arith.constant 0 : i32
    %c0_i32_0 = arith.constant 0 : i32
    %c0_i32_1 = arith.constant 0 : i32
    %c0_i32_2 = arith.constant 0 : i32
    return %c0_i32, %c0_i32_0, %c0_i32_1 : i32, i32, i32
  }
  func.func @transform_4(%arg0: i32) -> (i32, i32) {
    %c0_i32 = arith.constant 0 : i32
    %c0_i32_0 = arith.constant 0 : i32
    %c0_i32_1 = arith.constant 0 : i32
    return %c0_i32, %c0_i32_0 : i32, i32
  }
  func.func @transform_5(%arg0: i32) -> (i32, i32, i32) {
    %c0_i32 = arith.constant 0 : i32
    %c0_i32_0 = arith.constant 0 : i32
    %c0_i32_1 = arith.constant 0 : i32
    return %arg0, %c0_i32, %c0_i32_0 : i32, i32, i32
  }
}

</mosaic_0001>

<bundles_post_ra>
// kernel: simple_cnn_forward.1
= control target key start
LH: loop header
LB: loop body
LE: loop exit
PB: predicated region body
PF: predicated region fallthrough
CT: control target
= control target key end

     0   :  { %10 = vsyncpa [#allocation3], 0  ;;  %s5955_s0 = inlined_call_operand.vmem [shape: f32[2,27,1024], index: 0, kind: input, shape index: {}]   ;;  %s5956_s1 = inlined_call_operand.vmem [shape: f32[16,27], index: 1, kind: input, shape index: {}]   ;;  %s5957_s2 = inlined_call_operand.vmem [shape: f32[16,1], index: 2, kind: input, shape index: {}]   ;;  %s5958_s3 = inlined_call_operand.vmem [shape: f32[16,256,128], index: 3, kind: input, shape index: {}]   ;;  %s5959_s4 = inlined_call_operand.vmem [shape: f32[1,128], index: 4, kind: input, shape index: {}]   ;;  %s5960_s5 = inlined_call_operand.hbm [shape: f32[2,1,128], index: 5, kind: output, shape index: {}]  }
   0x1   :  { %12 = vsyncpa [#allocation3 + $0x1], 0  ;;  %s4188_s18 = smov 0   ;;  %s4190_s19 = smov 0  }
   0x2   :  { %s4192_s20 = smov 0   ;;  %s4194_s21 = smov 0  }
   0x3 LB: > { %s4209_s22 = sadd.s32 4294967295, %s4152_s21   ;;  %s2429_s23 = sadd.s32 4294967294, %s4152_s21   ;;  %s4152_s21 = sphi %s4194_s21, %s5968_s21   ;;  %s4148_s20 = sphi %s4192_s20, %s5967_s20   ;;  %s4144_s19 = sphi %s4190_s19, %s5966_s19   ;;  %s4140_s18 = sphi %s4188_s18, %s5965_s18  }
   0x4   : > { %s4213_s24 = sadd.s32 1, %s4152_s21   ;;  %s135_s25 = sadd.s32 1, %s4148_s20 }
   0x5   : > { %s132_s26 = ssub.s32 %s4152_s21, %s4213_s24  ;;  %p145_p0 = scmp.ne.s32.totalorder %s4148_s20, %s4144_s19 }
   0x6   : > { %p133_p1 = scmp.eq.s32.totalorder %s132_s26, 0  ;;  %p146_p2 = scmp.eq.s32.totalorder %s4209_s22, 1 }
   0x7   : > { %p151_p3 = scmp.ne.s32.totalorder %s4144_s19, %s4140_s18  ;;  %p152_p4 = scmp.eq.s32.totalorder %s2429_s23, 1 }
   0x8   : > { %s4224_s27 = scalar_select %p133_p1, %s4148_s20, %s135_s25  }
   0x9   : > { %p4226_p5 = por %p146_p2, %p145_p0  ;;  %p4230_p6 = por %p152_p4, %p151_p3 }
   0xa   : > { %p2432_p7 = scmp.ge.s32.totalorder %s4152_s21, 1  ;;  %p190_p8 = scmp.lt.s32.totalorder %s4152_s21, 3 }
   0xc   : > { %p191_p9 = pnand %p2432_p7, %p190_p8 }
   0xd   : > { %p217_p10 = scmp.lt.s32.totalorder (!%p191_p9), %s4209_s22, 1  ;;  %v4154_v0 = vmov (!%p191_p9), 0.0   ;;  %v256_v1 = vld [vmem:[%s5957_s2] sm:$0xff] (!%p191_p9)  ;;  %vm275_vm0 = vcmask (!%p191_p9), 1042432   ;;  %v4155_v2 = vmov (!%p191_p9), 0   ;;  %v257_v3 = vld [vmem:[%s5957_s2 + $0x8] sm:$0xff] (!%p191_p9) }
   0xe   : > { %194 = sbr.rel (%p191_p9) target bundleno = 725 (0x2d5), region = 40  ;;  %364 = vmatprep.mubr.f32.mxu0 (!%p191_p9), %v4154_v0  ;;  %441 = vmatprep.mubr.f32.mxu1 (!%p191_p9), %v4154_v0  ;;  %vm4156_vm1 = vmmov (!%p191_p9), 1   ;;  %v4280_v31 = vld [vmem:[%s5956_s1] sm:$0xff] (!%p191_p9)  ;;  %vm268_vm3 = vcmask (!%p191_p9), 220160   ;;  %v654_v53 = vld [vmem:[%s5958_s3 + $0x88] sm:$0xff] (!%p191_p9)  ;;  %v2453_v4 = vld [vmem:[%s5958_s3 + $0x110] sm:$0xff] (!%p191_p9) }
   0xf   : > { %4089 = vset.pattern.permute.xlu0 (!%p191_p9), %v4155_v2  ;;  %vm4251_vm2 = vmpackc.low (!%p191_p9), %vm275_vm0, %vm4156_vm1  ;;  %v653_v52 = vld [vmem:[%s5958_s3 + $0x80] sm:$0xff] (!%p191_p9)  ;;  %v255_v54 = vld [vmem:[%s5956_s1 + $0x8] sm:$0xff] (!%p191_p9)  ;;  %s215_s26 = sand.u32 (!%p191_p9), 1, %s4144_s19   ;;  %s2931_s30 = sshll.u32 (!%p191_p9), %s4209_s22, 4 }
  0x10   : > { %260 = vperm.xlu0 (!%p191_p9), %4089, %v256_v1   ;;  %v2467_v56 = vld [vmem:[%s5958_s3 + $0x180] sm:$0xff] (!%p191_p9)  ;;  %v2468_v57 = vld [vmem:[%s5958_s3 + $0x188] sm:$0xff] (!%p191_p9)  ;;  %v3535_v59 = vpack.c.bf16 (!%p191_p9), %v654_v53, %v653_v52  ;;  %v655_v2 = vld [vmem:[%s5958_s3 + $0x90] sm:$0xff] (!%p191_p9)  ;;  %s216_s6 = scalar_lea.vmem (!%p191_p9), [#allocation2], %s215_s26  ;;  %s5913_s10 = scalar_lea.hbm (!%p191_p9), %s5960_s5, %s2931_s30 }
  0x11   : > { %v637_v60 = vld [vmem:[%s5958_s3] sm:$0xff] (!%p191_p9)  ;;  %v638_v61 = vld [vmem:[%s5958_s3 + $0x8] sm:$0xff] (!%p191_p9)  ;;  %v3567_v63 = vpack.c.bf16 (!%p191_p9), %v2468_v57, %v2467_v56  ;;  %v664_v52 = vld [vmem:[%s5958_s3 + $0xd8] sm:$0xff] (!%p191_p9)  ;;  %s2362_s11 = scalar_lea.sflag (!%p191_p9), [#allocation3], %s215_s26 }
  0x12   : > { %v2451_v62 = vld [vmem:[%s5958_s3 + $0x100] sm:$0xff] (!%p191_p9)  ;;  %v2452_v1 = vld [vmem:[%s5958_s3 + $0x108] sm:$0xff] (!%p191_p9)  ;;  %v2477_v57 = vld [vmem:[%s5958_s3 + $0x1d0] sm:$0xff] (!%p191_p9) }
  0x14   : > { %265 = vperm.xlu0 (!%p191_p9), %4089, %v257_v3   ;;  %v656_v3 = vld [vmem:[%s5958_s3 + $0x98] sm:$0xff] (!%p191_p9) }
  0x15   : > { %s218_s7 = scalar_select %p217_p10, %s4209_s22, 1 }
  0x16   : > { %s4157_s22 = smov [#allocation2]  }
  0x17   : > { %s2934_s8 = sshll.u32 %s218_s7, 8  ;;  %s2374_s7 = sshll.u32 %s216_s6, 4  ;;  %s5915_s7 = int_to_ptr.vmem [resolvable:$true] %s2374_s7 }
  0x18   : > { %s4249_s13 = scalar_lea.vmem %s5955_s0, %s2934_s8  ;;  %s4090_s12 = scalar_lea.vmem %s5915_s7, 16 }
  0x19   : > { %v223_v5 = vld [vmem:[%s4249_s13 + $0x8] sm:$0xff]  ;;  %v225_v7 = vld [vmem:[%s4249_s13 + $0x18] sm:$0xff]  ;;  %v222_v10 = vld [vmem:[%s4249_s13] sm:$0xff]  ;;  %p4091_p11 = scmp.ne.s32.totalorder %s5915_s7, %s4090_s12 }
  0x1a   : > { %v231_v6 = vld [vmem:[%s4249_s13 + $0x48] sm:$0xff]  ;;  %v233_v9 = vld [vmem:[%s4249_s13 + $0x58] sm:$0xff]  ;;  %v230_v11 = vld [vmem:[%s4249_s13 + $0x40] sm:$0xff] }
  0x1b   : > { %v3495_v8 = vpack.c.bf16 %v231_v6, %v223_v5  ;;  %v3505_v12 = vpack.c.bf16 %v233_v9, %v225_v7  ;;  %v3497_v13 = vpack.c.bf16 %v230_v11, %v222_v10  ;;  %v224_v14 = vld [vmem:[%s4249_s13 + $0x10] sm:$0xff]  ;;  %v239_v16 = vld [vmem:[%s4249_s13 + $0x88] sm:$0xff]  ;;  %v241_v19 = vld [vmem:[%s4249_s13 + $0x98] sm:$0xff]  ;;  %v3537_v7 = vpack.c.bf16 %v638_v61, %v637_v60  ;;  %p4092_p12 = pnand %p4091_p11, %p4226_p5 }
  0x1c   : > { %v232_v15 = vld [vmem:[%s4249_s13 + $0x50] sm:$0xff]  ;;  %v247_v18 = vld [vmem:[%s4249_s13 + $0xc8] sm:$0x7]  ;;  %v249_v20 = vld [vmem:[%s4249_s13 + $0xd8] sm:$0x7]  ;;  %v3539_v9 = vpack.c.bf16 %v656_v3, %v655_v2 }
  0x1d   : > { %3496 = vmatprep.subr.bf16.mxu0 %v3495_v8  ;;  %v3507_v17 = vpack.c.bf16 %v232_v15, %v224_v14  ;;  %3506 = vmatprep.subr.bf16.mxu1 %v3505_v12  ;;  %v3499_v21 = vpack.c.bf16 %v247_v18, %v239_v16  ;;  %v3509_v22 = vpack.c.bf16 %v249_v20, %v241_v19  ;;  %v238_v23 = vld [vmem:[%s4249_s13 + $0x80] sm:$0xff]  ;;  %v240_v25 = vld [vmem:[%s4249_s13 + $0x90] sm:$0xff]  ;;  %v227_v28 = vld [vmem:[%s4249_s13 + $0x28] sm:$0xff]  ;;  %p4093_p13 = pneg %p4092_p12 }
  0x1e   : > { %3498 = vmatpush1.bf16.msra.mxu0 %v3497_v13  ;;  %v246_v24 = vld [vmem:[%s4249_s13 + $0xc0] sm:$0x7]  ;;  %v248_v27 = vld [vmem:[%s4249_s13 + $0xd0] sm:$0x7]  ;;  %v235_v29 = vld [vmem:[%s4249_s13 + $0x68] sm:$0xff]  ;;  %v3569_v8 = vpack.c.bf16 %v2452_v1, %v2451_v62 }
  0x1f   : > { %3508 = vmatpush1.bf16.msra.mxu1 %v3507_v17  ;;  %v3502_v26 = vpack.c.bf16 %v246_v24, %v238_v23  ;;  %3501 = vmatprep.subr.msk.bf16.mxu0 %vm4251_vm2, %v3499_v21  ;;  %v3512_v30 = vpack.c.bf16 %v248_v27, %v240_v25  ;;  %v3515_v32 = vpack.c.bf16 %v235_v29, %v227_v28  ;;  %v229_v33 = vld [vmem:[%s4249_s13 + $0x38] sm:$0xff]  ;;  %v226_v35 = vld [vmem:[%s4249_s13 + $0x20] sm:$0xff]  ;;  %v228_v38 = vld [vmem:[%s4249_s13 + $0x30] sm:$0xff] }
  0x20   : > { %3511 = vmatprep.subr.msk.bf16.mxu1 %vm4251_vm2, %v3509_v22  ;;  %v237_v34 = vld [vmem:[%s4249_s13 + $0x78] sm:$0xff]  ;;  %v234_v37 = vld [vmem:[%s4249_s13 + $0x60] sm:$0xff]  ;;  %v236_v39 = vld [vmem:[%s4249_s13 + $0x70] sm:$0xff] }
  0x21   : > { %v3525_v36 = vpack.c.bf16 %v237_v34, %v229_v33  ;;  %v3517_v40 = vpack.c.bf16 %v234_v37, %v226_v35  ;;  %v243_v41 = vld [vmem:[%s4249_s13 + $0xa8] sm:$0xff]  ;;  %v245_v43 = vld [vmem:[%s4249_s13 + $0xb8] sm:$0xff]  ;;  %v3527_v44 = vpack.c.bf16 %v236_v39, %v228_v38  ;;  %v242_v46 = vld [vmem:[%s4249_s13 + $0xa0] sm:$0xff] }
  0x22   : > { %3504 = vmatpush1.bf16.msk.msra.mxu0 %vm4251_vm2, %v3502_v26  ;;  %v251_v42 = vld [vmem:[%s4249_s13 + $0xe8] sm:$0x7]  ;;  %v253_v45 = vld [vmem:[%s4249_s13 + $0xf8] sm:$0x7]  ;;  %v250_v47 = vld [vmem:[%s4249_s13 + $0xe0] sm:$0x7] }
  0x23   : > { %3514 = vmatpush1.bf16.msk.msra.mxu1 %vm4251_vm2, %v3512_v30  ;;  %3516 = vmatprep.subr.bf16.mxu0 %v3515_v32  ;;  %v3519_v48 = vpack.c.bf16 %v251_v42, %v243_v41  ;;  %v244_v49 = vld [vmem:[%s4249_s13 + $0xb0] sm:$0xff]  ;;  %v3529_v51 = vpack.c.bf16 %v253_v45, %v245_v43  ;;  %v3522_v55 = vpack.c.bf16 %v250_v47, %v242_v46  ;;  %v2470_v6 = vld [vmem:[%s5958_s3 + $0x198] sm:$0xff]  ;;  %v657_v14 = vld [vmem:[%s5958_s3 + $0xa0] sm:$0xff] }
  0x24   : > { %3526 = vmatprep.subr.bf16.mxu1 %v3525_v36  ;;  %v252_v50 = vld [vmem:[%s4249_s13 + $0xf0] sm:$0x7]  ;;  %v640_v11 = vld [vmem:[%s5958_s3 + $0x18] sm:$0xff]  ;;  %v658_v15 = vld [vmem:[%s5958_s3 + $0xa8] sm:$0xff]  ;;  %s4094_s13 = sshll.u32 %s4157_s22, 4  ;;  %s4095_s13 = int_to_ptr.vmem [resolvable:$false] %s4094_s13 }
  0x25   : > { %2437 = vmatmul.mubr.msk.f32.vlgmr.msra.gmra.mrb[0].mxu0 %vm268_vm3, %v4280_v31  ;;  %v3532_v58 = vpack.c.bf16 %v252_v50, %v244_v49  ;;  %v2469_v5 = vld [vmem:[%s5958_s3 + $0x190] sm:$0xff]  ;;  %v2454_v13 = vld [vmem:[%s5958_s3 + $0x118] sm:$0xff]  ;;  %v2471_v16 = vld [vmem:[%s5958_s3 + $0x1a0] sm:$0xff]  ;;  %v3543_v20 = vpack.c.bf16 %v658_v15, %v657_v14  ;;  %s4096_s14 = scalar_lea.vmem %s4095_s13, 32  ;;  %p4097_p0 = scmp.lt.s32.totalorder %s5915_s7, %s4095_s13 }
  0x26   : > { %2441 = vmatmul.mubr.msk.f32.vlgmr.msra.gmra.mrb[0].mxu1 %vm268_vm3, %v4280_v31  ;;  %3518 = vmatpush1.bf16.msra.mxu0 %v3517_v40  ;;  %v639_v10 = vld [vmem:[%s5958_s3 + $0x10] sm:$0xff]  ;;  %v3571_v12 = vpack.c.bf16 %v2470_v6, %v2469_v5  ;;  %v2472_v17 = vld [vmem:[%s5958_s3 + $0x1a8] sm:$0xff]  ;;  %v3573_v19 = vpack.c.bf16 %v2454_v13, %v2453_v4  ;;  %v641_v21 = vld [vmem:[%s5958_s3 + $0x20] sm:$0xff]  ;;  %p4098_p1 = scmp.lt.s32.totalorder %s4096_s14, %s4090_s12 }
  0x27   : > { %3528 = vmatpush1.bf16.msra.mxu1 %v3527_v44  ;;  %370 = vmatprep.mubr.f32.mxu0 %v4154_v0  ;;  %v3541_v18 = vpack.c.bf16 %v640_v11, %v639_v10  ;;  %v642_v22 = vld [vmem:[%s5958_s3 + $0x28] sm:$0xff]  ;;  %v2455_v23 = vld [vmem:[%s5958_s3 + $0x120] sm:$0xff]  ;;  %v659_v25 = vld [vmem:[%s5958_s3 + $0xb0] sm:$0xff] }
  0x28   : > { %447 = vmatprep.mubr.f32.mxu1 %v4154_v0  ;;  %3521 = vmatprep.subr.msk.bf16.mxu0 %vm4251_vm2, %v3519_v48  ;;  %v2456_v24 = vld [vmem:[%s5958_s3 + $0x128] sm:$0xff]  ;;  %v660_v26 = vld [vmem:[%s5958_s3 + $0xb8] sm:$0xff]  ;;  %v3545_v27 = vpack.c.bf16 %v642_v22, %v641_v21  ;;  %v643_v30 = vld [vmem:[%s5958_s3 + $0x30] sm:$0xff]  ;;  %p4099_p2 = por %p4098_p1, %p4097_p0 }
  0x29   : > { %2438 = vmatmul.mubr.msk.f32.gmra.mrb[2].mxu0 %vm268_vm3, %v255_v54  ;;  %3531 = vmatprep.subr.msk.bf16.mxu1 %vm4251_vm2, %v3529_v51  ;;  %v3577_v28 = vpack.c.bf16 %v2456_v24, %v2455_v23  ;;  %v3547_v29 = vpack.c.bf16 %v660_v26, %v659_v25  ;;  %v2473_v33 = vld [vmem:[%s5958_s3 + $0x1b0] sm:$0xff]  ;;  %v2474_v34 = vld [vmem:[%s5958_s3 + $0x1b8] sm:$0xff]  ;;  %v661_v39 = vld [vmem:[%s5958_s3 + $0xc0] sm:$0xff] }
  0x2a   : > { %2442 = vmatmul.mubr.msk.f32.gmra.mrb[2].mxu1 %vm268_vm3, %v255_v54  ;;  %3524 = vmatpush1.bf16.msk.msra.mxu0 %vm4251_vm2, %v3522_v55  ;;  %v3579_v35 = vpack.c.bf16 %v2474_v34, %v2473_v33  ;;  %v2457_v36 = vld [vmem:[%s5958_s3 + $0x130] sm:$0xff]  ;;  %v2458_v37 = vld [vmem:[%s5958_s3 + $0x138] sm:$0xff]  ;;  %v662_v40 = vld [vmem:[%s5958_s3 + $0xc8] sm:$0xff]  ;;  %p4100_p3 = pnand %p4099_p2, %p4093_p13 }
  0x2b   : > { %3534 = vmatpush1.bf16.msk.msra.mxu1 %vm4251_vm2, %v3532_v58  ;;  %518 = vmatprep.mubr.f32.mxu0 %v4154_v0  ;;  %v3581_v38 = vpack.c.bf16 %v2458_v37, %v2457_v36  ;;  %v3551_v41 = vpack.c.bf16 %v662_v40, %v661_v39  ;;  %v645_v42 = vld [vmem:[%s5958_s3 + $0x40] sm:$0xff]  ;;  %v646_v43 = vld [vmem:[%s5958_s3 + $0x48] sm:$0xff]  ;;  %v663_v51 = vld [vmem:[%s5958_s3 + $0xd0] sm:$0xff] }
  0x2c   : > { %595 = vmatprep.mubr.f32.mxu1 %v4154_v0  ;;  %3536 = vmatprep.subr.bf16.mxu0 %v3535_v59  ;;  %v3553_v44 = vpack.c.bf16 %v646_v43, %v645_v42  ;;  %v2475_v45 = vld [vmem:[%s5958_s3 + $0x1c0] sm:$0xff]  ;;  %v2476_v46 = vld [vmem:[%s5958_s3 + $0x1c8] sm:$0xff]  ;;  %v3555_v53 = vpack.c.bf16 %v664_v52, %v663_v51  ;;  %v648_v55 = vld [vmem:[%s5958_s3 + $0x58] sm:$0xff] }
  0x2d   : > { %2445 = vmatmul.mubr.msk.f32.vlgmr.msra.gmra.mrb[4].mxu0 %vm268_vm3, %v4280_v31  ;;  %3568 = vmatprep.subr.bf16.mxu1 %v3567_v63  ;;  %v3583_v47 = vpack.c.bf16 %v2476_v46, %v2475_v45  ;;  %v2459_v48 = vld [vmem:[%s5958_s3 + $0x140] sm:$0xff]  ;;  %v2460_v49 = vld [vmem:[%s5958_s3 + $0x148] sm:$0xff]  ;;  %v2478_v58 = vld [vmem:[%s5958_s3 + $0x1d8] sm:$0xff] }
  0x2e   : > { %2449 = vmatmul.mubr.msk.f32.vlgmr.msra.gmra.mrb[4].mxu1 %vm268_vm3, %v4280_v31  ;;  %524 = vmatprep.mubr.f32.mxu0 %v4154_v0  ;;  %v644_v31 = vld [vmem:[%s5958_s3 + $0x38] sm:$0xff]  ;;  %v3585_v50 = vpack.c.bf16 %v2460_v49, %v2459_v48  ;;  %v3587_v59 = vpack.c.bf16 %v2478_v58, %v2477_v57  ;;  %v2461_v60 = vld [vmem:[%s5958_s3 + $0x150] sm:$0xff]  ;;  %v665_v63 = vld [vmem:[%s5958_s3 + $0xe0] sm:$0xff] }
  0x2f   : > { %601 = vmatprep.mubr.f32.mxu1 %v4154_v0  ;;  %3538 = vmatpush3.bf16.msra.mxu0 %v3537_v7  ;;  %v3575_v0 = vpack.c.bf16 %v2472_v17, %v2471_v16  ;;  %v3549_v32 = vpack.c.bf16 %v644_v31, %v643_v30  ;;  %v2462_v61 = vld [vmem:[%s5958_s3 + $0x158] sm:$0xff]  ;;  %v666_v1 = vld [vmem:[%s5958_s3 + $0xe8] sm:$0xff]  ;;  %v649_v3 = vld [vmem:[%s5958_s3 + $0x60] sm:$0xff] }
  0x30   : > { %3570 = vmatpush3.bf16.msra.mxu1 %v3569_v8  ;;  %3540 = vmatprep.subr.bf16.mxu0 %v3539_v9  ;;  %v3589_v62 = vpack.c.bf16 %v2462_v61, %v2461_v60  ;;  %v3559_v2 = vpack.c.bf16 %v666_v1, %v665_v63  ;;  %v650_v5 = vld [vmem:[%s5958_s3 + $0x68] sm:$0xff]  ;;  %v2479_v7 = vld [vmem:[%s5958_s3 + $0x1e0] sm:$0xff]  ;;  %v668_v13 = vld [vmem:[%s5958_s3 + $0xf8] sm:$0xff] }
  0x31   : > { %2446 = vmatmul.mubr.msk.f32.gmra.mrb[6].mxu0 %vm268_vm3, %v255_v54  ;;  %3572 = vmatprep.subr.bf16.mxu1 %v3571_v12  ;;  %v3561_v6 = vpack.c.bf16 %v650_v5, %v649_v3  ;;  %v2480_v8 = vld [vmem:[%s5958_s3 + $0x1e8] sm:$0xff]  ;;  %v2463_v10 = vld [vmem:[%s5958_s3 + $0x160] sm:$0xff]  ;;  %v667_v12 = vld [vmem:[%s5958_s3 + $0xf0] sm:$0xff] }
  0x32   : > { %2450 = vmatmul.mubr.msk.f32.gmra.mrb[6].mxu1 %vm268_vm3, %v255_v54  ;;  %v647_v54 = vld [vmem:[%s5958_s3 + $0x50] sm:$0xff]  ;;  %v3591_v9 = vpack.c.bf16 %v2480_v8, %v2479_v7  ;;  %v2464_v11 = vld [vmem:[%s5958_s3 + $0x168] sm:$0xff]  ;;  %v3563_v14 = vpack.c.bf16 %v668_v13, %v667_v12  ;;  %v652_v16 = vld [vmem:[%s5958_s3 + $0x78] sm:$0xff] }
  0x33   : > { %3542 = vmatpush3.bf16.msra.mxu0 %v3541_v18  ;;  %v3557_v56 = vpack.c.bf16 %v648_v55, %v647_v54  ;;  %v3593_v4 = vpack.c.bf16 %v2464_v11, %v2463_v10  ;;  %v651_v15 = vld [vmem:[%s5958_s3 + $0x70] sm:$0xff]  ;;  %v2466_v22 = vld [vmem:[%s5958_s3 + $0x178] sm:$0xff]  ;;  %v2500_v24 = vld [vmem:[%s5958_s3 + $0x288] sm:$0xff] }
  0x34   : > { %3574 = vmatpush3.bf16.msra.mxu1 %v3573_v19  ;;  %3544 = vmatprep.subr.bf16.mxu0 %v3543_v20  ;;  %v3565_v17 = vpack.c.bf16 %v652_v16, %v651_v15  ;;  %v2481_v18 = vld [vmem:[%s5958_s3 + $0x1f0] sm:$0xff]  ;;  %v2482_v19 = vld [vmem:[%s5958_s3 + $0x1f8] sm:$0xff]  ;;  %v2531_v26 = vld [vmem:[%s5958_s3 + $0x380] sm:$0xff] }
  0x35   : > { %3576 = vmatprep.subr.bf16.mxu1 %v3575_v0  ;;  %v3595_v20 = vpack.c.bf16 %v2482_v19, %v2481_v18  ;;  %v2465_v21 = vld [vmem:[%s5958_s3 + $0x170] sm:$0xff]  ;;  %v2499_v0 = vld [vmem:[%s5958_s3 + $0x280] sm:$0xff] }
  0x36   : > { %v3597_v23 = vpack.c.bf16 %v2466_v22, %v2465_v21  ;;  %v3599_v25 = vpack.c.bf16 %v2500_v24, %v2499_v0  ;;  %v2483_v16 = vld [vmem:[%s5958_s3 + $0x200] sm:$0xff]  ;;  %v2516_v22 = vld [vmem:[%s5958_s3 + $0x308] sm:$0xff] }
  0x37   : > { %3546 = vmatpush3.bf16.msra.mxu0 %v3545_v27  ;;  %v2532_v27 = vld [vmem:[%s5958_s3 + $0x388] sm:$0xff]  ;;  %v2515_v21 = vld [vmem:[%s5958_s3 + $0x300] sm:$0xff] }
  0x38   : > { %3578 = vmatpush3.bf16.msra.mxu1 %v3577_v28  ;;  %3548 = vmatprep.subr.bf16.mxu0 %v3547_v29  ;;  %v3631_v28 = vpack.c.bf16 %v2532_v27, %v2531_v26  ;;  %v2502_v26 = vld [vmem:[%s5958_s3 + $0x298] sm:$0xff] }
  0x39   : > { %3580 = vmatprep.subr.bf16.mxu1 %v3579_v35 }
  0x3b   : > { %3550 = vmatpush3.bf16.msra.mxu0 %v3549_v32 }
  0x3c   : > { %3582 = vmatpush3.bf16.msra.mxu1 %v3581_v38  ;;  %3552 = vmatprep.subr.bf16.mxu0 %v3551_v41 }
  0x3d   : > { %3584 = vmatprep.subr.bf16.mxu1 %v3583_v47 }
  0x3f   : > { %3554 = vmatpush3.bf16.msra.mxu0 %v3553_v44 }
  0x40   : > { %3586 = vmatpush3.bf16.msra.mxu1 %v3585_v50  ;;  %3556 = vmatprep.subr.bf16.mxu0 %v3555_v53 }
  0x41   : > { %3588 = vmatprep.subr.bf16.mxu1 %v3587_v59 }
  0x43   : > { %3558 = vmatpush3.bf16.msra.mxu0 %v3557_v56 }
  0x44   : > { %3590 = vmatpush3.bf16.msra.mxu1 %v3589_v62  ;;  %3560 = vmatprep.subr.bf16.mxu0 %v3559_v2 }
  0x45   : > { %3592 = vmatprep.subr.bf16.mxu1 %v3591_v9 }
  0x47   : > { %3562 = vmatpush3.bf16.msra.mxu0 %v3561_v6 }
  0x48   : > { %3594 = vmatpush3.bf16.msra.mxu1 %v3593_v4  ;;  %3564 = vmatprep.subr.bf16.mxu0 %v3563_v14 }
  0x49   : > { %3596 = vmatprep.subr.bf16.mxu1 %v3595_v20 }
  0x4b   : > { %3566 = vmatpush3.bf16.msra.mxu0 %v3565_v17  ;;  %v2484_v17 = vld [vmem:[%s5958_s3 + $0x208] sm:$0xff] }
  0x4c   : > { %3598 = vmatpush3.bf16.msra.mxu1 %v3597_v23  ;;  %3600 = vmatprep.subr.bf16.mxu0 %v3599_v25  ;;  %v2501_v25 = vld [vmem:[%s5958_s3 + $0x290] sm:$0xff] }
  0x4d   : > { %3632 = vmatprep.subr.bf16.mxu1 %v3631_v28 }
  0x8f   : > { %v261_v29 = vpop.permute.xlu0 %260 }
  0x93   : > { %v266_v36 = vpop.permute.xlu0 %265 }
  0xf8   : > { %v366_v30 = vpop.f32.mrb[0].mxu0 }
  0xf9   : > { %v443_v31 = vpop.f32.mrb[0].mxu1  ;;  %v368_v32 = vpop.f32.mrb[1].mxu0  ;;  %v367_v33 = vadd.f32 %v366_v30, %v261_v29  ;;  %v2533_v30 = vld [vmem:[%s5958_s3 + $0x390] sm:$0xff] }
  0xfa   : > { %v369_v34 = vadd.f32 %v368_v32, %v261_v29  ;;  %v445_v35 = vpop.f32.mrb[1].mxu1  ;;  %v444_v37 = vadd.f32 %v443_v31, %v261_v29  ;;  %v2534_v31 = vld [vmem:[%s5958_s3 + $0x398] sm:$0xff] }
  0xfb   : > { %v446_v38 = vadd.f32 %v445_v35, %v261_v29  ;;  %v608_v39 = vmax.f32 %v367_v33, 0.0  ;;  %v3633_v33 = vpack.c.bf16 %v2516_v22, %v2515_v21  ;;  %v2486_v35 = vld [vmem:[%s5958_s3 + $0x218] sm:$0xff]  ;;  %v2524_v21 = vld [vmem:[%s5958_s3 + $0x348] sm:$0xff] }
  0xfc   : > { %v609_v40 = vmax.f32 %v369_v34, 0.0  ;;  %v372_v41 = vpop.f32.mrb[2].mxu0  ;;  %v610_v42 = vmax.f32 %v444_v37, 0.0  ;;  %v2485_v34 = vld [vmem:[%s5958_s3 + $0x210] sm:$0xff] }
  0xfd   : > { %v611_v43 = vmax.f32 %v446_v38, 0.0  ;;  %v449_v44 = vpop.f32.mrb[2].mxu1  ;;  %v374_v45 = vpop.f32.mrb[3].mxu0  ;;  %v373_v46 = vadd.f32 %v372_v41, %v266_v36  ;;  %v2504_v41 = vld [vmem:[%s5958_s3 + $0x2a8] sm:$0xff] }
  0xfe   : > { %v375_v47 = vadd.f32 %v374_v45, %v266_v36  ;;  %v451_v48 = vpop.f32.mrb[3].mxu1  ;;  %v624_v49 = vmax.f32 %v608_v39, %v610_v42  ;;  %v450_v50 = vadd.f32 %v449_v44, %v266_v36  ;;  %v3603_v39 = vpack.c.bf16 %v2502_v26, %v2501_v25  ;;  %v2517_v45 = vld [vmem:[%s5958_s3 + $0x310] sm:$0xff] }
  0xff   : > { %v625_v51 = vmax.f32 %v609_v40, %v611_v43  ;;  %v452_v52 = vadd.f32 %v451_v48, %v266_v36  ;;  %v616_v53 = vmax.f32 %v373_v46, 0.0  ;;  %v2503_v40 = vld [vmem:[%s5958_s3 + $0x2a0] sm:$0xff]  ;;  %v3635_v44 = vpack.c.bf16 %v2534_v31, %v2533_v30  ;;  %v2518_v46 = vld [vmem:[%s5958_s3 + $0x318] sm:$0xff]  ;;  %v2493_v26 = vld [vmem:[%s5958_s3 + $0x250] sm:$0xff] }
 0x100   : > { %v617_v54 = vmax.f32 %v375_v47, 0.0  ;;  %v520_v55 = vpop.f32.mrb[4].mxu0  ;;  %v618_v56 = vmax.f32 %v450_v50, 0.0  ;;  %v3605_v48 = vpack.c.bf16 %v2486_v35, %v2485_v34  ;;  %v2536_v50 = vld [vmem:[%s5958_s3 + $0x3a8] sm:$0xff]  ;;  %v2511_v30 = vld [vmem:[%s5958_s3 + $0x2e0] sm:$0xff]  ;;  %v2526_v34 = vld [vmem:[%s5958_s3 + $0x358] sm:$0xff] }
 0x101   : > { %v619_v57 = vmax.f32 %v452_v52, 0.0  ;;  %v521_v58 = vadd.f32 %v520_v55, %v261_v29  ;;  %v597_v59 = vpop.f32.mrb[4].mxu1  ;;  %v522_v60 = vpop.f32.mrb[5].mxu0  ;;  %v3607_v52 = vpack.c.bf16 %v2504_v41, %v2503_v40  ;;  %v3637_v55 = vpack.c.bf16 %v2518_v46, %v2517_v45  ;;  %v2512_v31 = vld [vmem:[%s5958_s3 + $0x2e8] sm:$0xff]  ;;  %v2527_v46 = vld [vmem:[%s5958_s3 + $0x360] sm:$0xff] }
 0x102   : > { %v598_v61 = vadd.f32 %v597_v59, %v261_v29  ;;  %v523_v62 = vadd.f32 %v522_v60, %v261_v29  ;;  %v599_v63 = vpop.f32.mrb[5].mxu1  ;;  %v626_v1 = vmax.f32 %v616_v53, %v618_v56  ;;  %v2487_v53 = vld [vmem:[%s5958_s3 + $0x220] sm:$0xff]  ;;  %v2505_v56 = vld [vmem:[%s5958_s3 + $0x2b0] sm:$0xff]  ;;  %v2520_v60 = vld [vmem:[%s5958_s3 + $0x328] sm:$0xff] }
 0x103   : > { %v627_v2 = vmax.f32 %v617_v54, %v619_v57  ;;  %v612_v3 = vmax.f32 %v521_v58, 0.0  ;;  %v600_v5 = vadd.f32 %v599_v63, %v261_v29  ;;  %v3601_v29 = vpack.c.bf16 %v2484_v17, %v2483_v16  ;;  %v2488_v54 = vld [vmem:[%s5958_s3 + $0x228] sm:$0xff]  ;;  %v2506_v57 = vld [vmem:[%s5958_s3 + $0x2b8] sm:$0xff]  ;;  %v2519_v59 = vld [vmem:[%s5958_s3 + $0x320] sm:$0xff] }
 0x104   : > { %v614_v6 = vmax.f32 %v598_v61, 0.0  ;;  %v613_v7 = vmax.f32 %v523_v62, 0.0  ;;  %v526_v8 = vpop.f32.mrb[6].mxu0  ;;  %v3609_v61 = vpack.c.bf16 %v2488_v54, %v2487_v53  ;;  %v2537_v62 = vld [vmem:[%s5958_s3 + $0x3b0] sm:$0xff]  ;;  %v2538_v63 = vld [vmem:[%s5958_s3 + $0x3b8] sm:$0xff]  ;;  %v2496_v40 = vld [vmem:[%s5958_s3 + $0x268] sm:$0xff] }
 0x105   : > { %v615_v9 = vmax.f32 %v600_v5, 0.0  ;;  %v527_v10 = vadd.f32 %v526_v8, %v266_v36  ;;  %v603_v11 = vpop.f32.mrb[6].mxu1  ;;  %v528_v4 = vpop.f32.mrb[7].mxu0  ;;  %v3641_v5 = vpack.c.bf16 %v2520_v60, %v2519_v59  ;;  %v3643_v8 = vpack.c.bf16 %v2538_v63, %v2537_v62  ;;  %v2509_v17 = vld [vmem:[%s5958_s3 + $0x2d0] sm:$0xff]  ;;  %v2498_v54 = vld [vmem:[%s5958_s3 + $0x278] sm:$0xff]  ;;  %v2595_v62 = vld [vmem:[%s5958_s3 + $0x580] sm:$0xff] }
 0x106   : > { %v628_v12 = vmax.f32 %v612_v3, %v614_v6  ;;  %v604_v13 = vadd.f32 %v603_v11, %v266_v36  ;;  %v529_v14 = vadd.f32 %v528_v4, %v266_v36  ;;  %v605_v15 = vpop.f32.mrb[7].mxu1  ;;  %v2490_v3 = vld [vmem:[%s5958_s3 + $0x238] sm:$0xff]  ;;  %v2507_v6 = vld [vmem:[%s5958_s3 + $0x2c0] sm:$0xff]  ;;  %v2497_v53 = vld [vmem:[%s5958_s3 + $0x270] sm:$0xff] }
 0x107   : > { %v629_v18 = vmax.f32 %v613_v7, %v615_v9  ;;  %v620_v19 = vmax.f32 %v527_v10, 0.0  ;;  %v606_v20 = vadd.f32 %v605_v15, %v266_v36  ;;  %v2508_v7 = vld [vmem:[%s5958_s3 + $0x2c8] sm:$0xff]  ;;  %v2521_v9 = vld [vmem:[%s5958_s3 + $0x330] sm:$0xff]  ;;  %v2522_v10 = vld [vmem:[%s5958_s3 + $0x338] sm:$0xff] }
 0x108   : > { %v4545_v23 = vmax.f32 %v624_v49, %v628_v12  ;;  %v622_v0 = vmax.f32 %v604_v13, 0.0  ;;  %v621_v24 = vmax.f32 %v529_v14, 0.0  ;;  %v2535_v49 = vld [vmem:[%s5958_s3 + $0x3a0] sm:$0xff]  ;;  %v2540_v12 = vld [vmem:[%s5958_s3 + $0x3c8] sm:$0xff]  ;;  %v3615_v13 = vpack.c.bf16 %v2508_v7, %v2507_v6  ;;  %v2529_v59 = vld [vmem:[%s5958_s3 + $0x370] sm:$0xff] }
 0x109   : > { %v4553_v27 = vmax.f32 %v625_v51, %v629_v18  ;;  %v623_v28 = vmax.f32 %v606_v20, 0.0  ;;  %v3639_v58 = vpack.c.bf16 %v2536_v50, %v2535_v49  ;;  %v2539_v4 = vld [vmem:[%s5958_s3 + $0x3c0] sm:$0xff]  ;;  %v2492_v15 = vld [vmem:[%s5958_s3 + $0x248] sm:$0xff]  ;;  %v3645_v16 = vpack.c.bf16 %v2522_v10, %v2521_v9  ;;  %v2510_v18 = vld [vmem:[%s5958_s3 + $0x2d8] sm:$0xff] }
 0x10a   : > { %v630_v32 = vmax.f32 %v620_v19, %v622_v0  ;;  %v775_v43 = vrot.slane %v4545_v23, 1  ;;  %v2491_v14 = vld [vmem:[%s5958_s3 + $0x240] sm:$0xff]  ;;  %v3647_v19 = vpack.c.bf16 %v2540_v12, %v2539_v4  ;;  %v2541_v0 = vld [vmem:[%s5958_s3 + $0x3d0] sm:$0xff]  ;;  %v3619_v25 = vpack.c.bf16 %v2510_v18, %v2509_v17  ;;  %v2530_v60 = vld [vmem:[%s5958_s3 + $0x378] sm:$0xff] }
 0x10b   : > { %v631_v36 = vmax.f32 %v621_v24, %v623_v28  ;;  %733 = vmatprep.mubr.f32.mxu0 %v4553_v27  ;;  %v776_v37 = vrot.slane %v4553_v27, 1  ;;  %v884_v38 = vrot.slane %v4553_v27, 2  ;;  %v992_v51 = vrot.slane %v4553_v27, 3  ;;  %v2523_v20 = vld [vmem:[%s5958_s3 + $0x340] sm:$0xff]  ;;  %v2542_v24 = vld [vmem:[%s5958_s3 + $0x3d8] sm:$0xff]  ;;  %v2545_v50 = vld [vmem:[%s5958_s3 + $0x3f0] sm:$0xff] }
 0x10c   : > { %v4576_v42 = vmax.f32 %v626_v1, %v630_v32  ;;  %734 = vmatmul.mubr.f32.vlgmr.msra.gmra.mrb[8].mxu0 %v4545_v23  ;;  %v3611_v1 = vpack.c.bf16 %v2506_v57, %v2505_v56  ;;  %v3617_v22 = vpack.c.bf16 %v2492_v15, %v2491_v14  ;;  %v2494_v28 = vld [vmem:[%s5958_s3 + $0x258] sm:$0xff]  ;;  %v3651_v32 = vpack.c.bf16 %v2542_v24, %v2541_v0  ;;  %v2563_v56 = vld [vmem:[%s5958_s3 + $0x480] sm:$0xff]  ;;  %v2564_v57 = vld [vmem:[%s5958_s3 + $0x488] sm:$0xff] }
 0x10d   : > { %v4586_v47 = vmax.f32 %v627_v2, %v631_v36  ;;  %3602 = vmatpush3.bf16.msra.mxu0 %v3601_v29  ;;  %843 = vmatprep.mubr.f32.mxu1 %v776_v37  ;;  %v2489_v2 = vld [vmem:[%s5958_s3 + $0x230] sm:$0xff]  ;;  %v3649_v29 = vpack.c.bf16 %v2524_v21, %v2523_v20  ;;  %v3621_v35 = vpack.c.bf16 %v2494_v28, %v2493_v26  ;;  %v2543_v36 = vld [vmem:[%s5958_s3 + $0x3e0] sm:$0xff]  ;;  %v2544_v37 = vld [vmem:[%s5958_s3 + $0x3e8] sm:$0xff]  ;;  %v1100_v17 = vrot.slane %v4553_v27, 4 }
 0x10e   : > { %951 = vmatprep.mubr.f32.mxu0 %v884_v38  ;;  %844 = vmatmul.mubr.f32.vlgmr.msra.gmra.mrb[8].mxu1 %v775_v43  ;;  %v3613_v11 = vpack.c.bf16 %v2490_v3, %v2489_v2  ;;  %v3623_v38 = vpack.c.bf16 %v2512_v31, %v2511_v30  ;;  %v2513_v43 = vld [vmem:[%s5958_s3 + $0x2f0] sm:$0xff]  ;;  %v3655_v45 = vpack.c.bf16 %v2544_v37, %v2543_v36  ;;  %v2596_v63 = vld [vmem:[%s5958_s3 + $0x588] sm:$0xff]  ;;  %v2547_v2 = vld [vmem:[%s5958_s3 + $0x400] sm:$0xff]  ;;  %v991_v21 = vrot.slane %v4545_v23, 3 }
 0x10f   : > { %3634 = vmatpush3.bf16.msra.mxu1 %v3633_v33  ;;  %3604 = vmatprep.subr.bf16.mxu0 %v3603_v39  ;;  %v2525_v33 = vld [vmem:[%s5958_s3 + $0x350] sm:$0xff]  ;;  %v2495_v39 = vld [vmem:[%s5958_s3 + $0x260] sm:$0xff]  ;;  %v2548_v3 = vld [vmem:[%s5958_s3 + $0x408] sm:$0xff] }
 0x110   : > { %1059 = vmatprep.mubr.f32.mxu1 %v992_v51  ;;  %3636 = vmatprep.subr.bf16.mxu1 %v3635_v44  ;;  %v3653_v41 = vpack.c.bf16 %v2526_v34, %v2525_v33  ;;  %v2514_v44 = vld [vmem:[%s5958_s3 + $0x2f8] sm:$0xff]  ;;  %v3625_v49 = vpack.c.bf16 %v2496_v40, %v2495_v39  ;;  %v2565_v6 = vld [vmem:[%s5958_s3 + $0x490] sm:$0xff]  ;;  %v2579_v9 = vld [vmem:[%s5958_s3 + $0x500] sm:$0xff] }
 0x111   : > { %3606 = vmatpush3.bf16.msra.mxu0 %v3605_v48  ;;  %v2528_v48 = vld [vmem:[%s5958_s3 + $0x368] sm:$0xff]  ;;  %v2546_v51 = vld [vmem:[%s5958_s3 + $0x3f8] sm:$0xff]  ;;  %v2597_v4 = vld [vmem:[%s5958_s3 + $0x590] sm:$0xff] }
 0x112   : > { %3608 = vmatprep.subr.bf16.mxu0 %v3607_v52  ;;  %v3627_v52 = vpack.c.bf16 %v2514_v44, %v2513_v43  ;;  %v2566_v7 = vld [vmem:[%s5958_s3 + $0x498] sm:$0xff]  ;;  %v2580_v10 = vld [vmem:[%s5958_s3 + $0x508] sm:$0xff]  ;;  %v2549_v15 = vld [vmem:[%s5958_s3 + $0x410] sm:$0xff] }
 0x113   : > { %3638 = vmatpush3.bf16.msra.mxu1 %v3637_v55  ;;  %v3657_v55 = vpack.c.bf16 %v2528_v48, %v2527_v46  ;;  %v2598_v12 = vld [vmem:[%s5958_s3 + $0x598] sm:$0xff]  ;;  %v3667_v14 = vpack.c.bf16 %v2566_v7, %v2565_v6  ;;  %v3697_v18 = vpack.c.bf16 %v2580_v10, %v2579_v9  ;;  %v2568_v20 = vld [vmem:[%s5958_s3 + $0x4a8] sm:$0xff]  ;;  %v2581_v0 = vld [vmem:[%s5958_s3 + $0x510] sm:$0xff] }
 0x114   : > { %3640 = vmatprep.subr.bf16.mxu1 %v3639_v58  ;;  %v3659_v58 = vpack.c.bf16 %v2546_v51, %v2545_v50  ;;  %v2582_v24 = vld [vmem:[%s5958_s3 + $0x518] sm:$0xff]  ;;  %v2599_v28 = vld [vmem:[%s5958_s3 + $0x5a0] sm:$0xff]  ;;  %v2569_v34 = vld [vmem:[%s5958_s3 + $0x4b0] sm:$0xff] }
 0x115   : > { %3610 = vmatpush3.bf16.msra.mxu0 %v3609_v61  ;;  %v3629_v61 = vpack.c.bf16 %v2498_v54, %v2497_v53  ;;  %v2551_v31 = vld [vmem:[%s5958_s3 + $0x420] sm:$0xff]  ;;  %v3701_v33 = vpack.c.bf16 %v2582_v24, %v2581_v0  ;;  %v2601_v40 = vld [vmem:[%s5958_s3 + $0x5b0] sm:$0xff] }
 0x116   : > { %3612 = vmatprep.subr.bf16.mxu0 %v3611_v1  ;;  %v3663_v1 = vpack.c.bf16 %v2564_v57, %v2563_v56  ;;  %v2583_v37 = vld [vmem:[%s5958_s3 + $0x520] sm:$0xff]  ;;  %v2553_v44 = vld [vmem:[%s5958_s3 + $0x430] sm:$0xff] }
 0x117   : > { %3642 = vmatpush3.bf16.msra.mxu1 %v3641_v5  ;;  %v3661_v5 = vpack.c.bf16 %v2530_v60, %v2529_v59  ;;  %v2571_v48 = vld [vmem:[%s5958_s3 + $0x4c0] sm:$0xff]  ;;  %v2585_v51 = vld [vmem:[%s5958_s3 + $0x530] sm:$0xff] }
 0x118   : > { %3644 = vmatprep.subr.bf16.mxu1 %v3643_v8  ;;  %v3695_v8 = vpack.c.bf16 %v2596_v63, %v2595_v62  ;;  %v2603_v54 = vld [vmem:[%s5958_s3 + $0x5c0] sm:$0xff]  ;;  %v2573_v60 = vld [vmem:[%s5958_s3 + $0x4d0] sm:$0xff] }
 0x119   : > { %3614 = vmatpush3.bf16.msra.mxu0 %v3613_v11  ;;  %v3665_v11 = vpack.c.bf16 %v2548_v3, %v2547_v2  ;;  %v2555_v57 = vld [vmem:[%s5958_s3 + $0x440] sm:$0xff]  ;;  %v2605_v3 = vld [vmem:[%s5958_s3 + $0x5d0] sm:$0xff] }
 0x11a   : > { %3616 = vmatprep.subr.bf16.mxu0 %v3615_v13  ;;  %v883_v13 = vrot.slane %v4545_v23, 2  ;;  %v2587_v63 = vld [vmem:[%s5958_s3 + $0x540] sm:$0xff]  ;;  %v2557_v7 = vld [vmem:[%s5958_s3 + $0x450] sm:$0xff] }
 0x11b   : > { %3646 = vmatpush3.bf16.msra.mxu1 %v3645_v16  ;;  %v2550_v16 = vld [vmem:[%s5958_s3 + $0x418] sm:$0xff]  ;;  %v2575_v10 = vld [vmem:[%s5958_s3 + $0x4e0] sm:$0xff] }
 0x11c   : > { %3648 = vmatprep.subr.bf16.mxu1 %v3647_v19  ;;  %v2567_v19 = vld [vmem:[%s5958_s3 + $0x4a0] sm:$0xff]  ;;  %v3669_v26 = vpack.c.bf16 %v2550_v16, %v2549_v15  ;;  %v2608_v16 = vld [vmem:[%s5958_s3 + $0x5e8] sm:$0xff] }
 0x11d   : > { %3618 = vmatpush3.bf16.msra.mxu0 %v3617_v22  ;;  %v3699_v22 = vpack.c.bf16 %v2598_v12, %v2597_v4  ;;  %v3671_v30 = vpack.c.bf16 %v2568_v20, %v2567_v19  ;;  %v2589_v12 = vld [vmem:[%s5958_s3 + $0x550] sm:$0xff]  ;;  %v2607_v15 = vld [vmem:[%s5958_s3 + $0x5e0] sm:$0xff]  ;;  %v2560_v19 = vld [vmem:[%s5958_s3 + $0x468] sm:$0xff] }
 0x11e   : > { %3620 = vmatprep.subr.bf16.mxu0 %v3619_v25  ;;  %v1208_v25 = vrot.slane %v4553_v27, 5  ;;  %v3719_v0 = vpack.c.bf16 %v2608_v16, %v2607_v15  ;;  %v2591_v24 = vld [vmem:[%s5958_s3 + $0x560] sm:$0xff]  ;;  %v2648_v16 = vld [vmem:[%s5958_s3 + $0x728] sm:$0xff] }
 0x11f   : > { %3650 = vmatpush3.bf16.msra.mxu1 %v3649_v29  ;;  %v2600_v29 = vld [vmem:[%s5958_s3 + $0x5a8] sm:$0xff]  ;;  %v2647_v15 = vld [vmem:[%s5958_s3 + $0x720] sm:$0xff] }
 0x120   : > { %3652 = vmatprep.subr.bf16.mxu1 %v3651_v32  ;;  %v2552_v32 = vld [vmem:[%s5958_s3 + $0x428] sm:$0xff]  ;;  %v3703_v36 = vpack.c.bf16 %v2600_v29, %v2599_v28  ;;  %v2609_v28 = vld [vmem:[%s5958_s3 + $0x5f0] sm:$0xff]  ;;  %v2610_v29 = vld [vmem:[%s5958_s3 + $0x5f8] sm:$0xff] }
 0x121   : > { %3622 = vmatpush3.bf16.msra.mxu0 %v3621_v35  ;;  %v2570_v35 = vld [vmem:[%s5958_s3 + $0x4b8] sm:$0xff]  ;;  %v3673_v39 = vpack.c.bf16 %v2552_v32, %v2551_v31  ;;  %v2561_v31 = vld [vmem:[%s5958_s3 + $0x470] sm:$0xff] }
 0x122   : > { %3624 = vmatprep.subr.bf16.mxu0 %v3623_v38  ;;  %v2584_v38 = vld [vmem:[%s5958_s3 + $0x528] sm:$0xff]  ;;  %v3675_v43 = vpack.c.bf16 %v2570_v35, %v2569_v34  ;;  %v2562_v32 = vld [vmem:[%s5958_s3 + $0x478] sm:$0xff]  ;;  %v2627_v34 = vld [vmem:[%s5958_s3 + $0x680] sm:$0xff] }
 0x123   : > { %3654 = vmatpush3.bf16.msra.mxu1 %v3653_v41  ;;  %v2602_v41 = vld [vmem:[%s5958_s3 + $0x5b8] sm:$0xff]  ;;  %v3705_v46 = vpack.c.bf16 %v2584_v38, %v2583_v37  ;;  %v2628_v35 = vld [vmem:[%s5958_s3 + $0x688] sm:$0xff]  ;;  %v2593_v37 = vld [vmem:[%s5958_s3 + $0x570] sm:$0xff] }
 0x124   : > { %3656 = vmatprep.subr.bf16.mxu1 %v3655_v45  ;;  %v2554_v45 = vld [vmem:[%s5958_s3 + $0x438] sm:$0xff]  ;;  %v3707_v50 = vpack.c.bf16 %v2602_v41, %v2601_v40  ;;  %v2659_v40 = vld [vmem:[%s5958_s3 + $0x780] sm:$0xff]  ;;  %v2660_v41 = vld [vmem:[%s5958_s3 + $0x788] sm:$0xff] }
 0x125   : > { %3626 = vmatpush3.bf16.msra.mxu0 %v3625_v49  ;;  %v2572_v49 = vld [vmem:[%s5958_s3 + $0x4c8] sm:$0xff]  ;;  %v3677_v53 = vpack.c.bf16 %v2554_v45, %v2553_v44  ;;  %v2594_v38 = vld [vmem:[%s5958_s3 + $0x578] sm:$0xff]  ;;  %v2611_v44 = vld [vmem:[%s5958_s3 + $0x600] sm:$0xff] }
 0x126   : > { %3628 = vmatprep.subr.bf16.mxu0 %v3627_v52  ;;  %v2586_v52 = vld [vmem:[%s5958_s3 + $0x538] sm:$0xff]  ;;  %v3679_v56 = vpack.c.bf16 %v2572_v49, %v2571_v48  ;;  %v2612_v45 = vld [vmem:[%s5958_s3 + $0x608] sm:$0xff]  ;;  %v2629_v48 = vld [vmem:[%s5958_s3 + $0x690] sm:$0xff] }
 0x127   : > { %3658 = vmatpush3.bf16.msra.mxu1 %v3657_v55  ;;  %v2604_v55 = vld [vmem:[%s5958_s3 + $0x5c8] sm:$0xff]  ;;  %v3709_v59 = vpack.c.bf16 %v2586_v52, %v2585_v51  ;;  %v2630_v49 = vld [vmem:[%s5958_s3 + $0x698] sm:$0xff]  ;;  %v2643_v51 = vld [vmem:[%s5958_s3 + $0x700] sm:$0xff] }
 0x128   : > { %3660 = vmatprep.subr.bf16.mxu1 %v3659_v58  ;;  %v2556_v58 = vld [vmem:[%s5958_s3 + $0x448] sm:$0xff]  ;;  %v3711_v62 = vpack.c.bf16 %v2604_v55, %v2603_v54  ;;  %v2661_v54 = vld [vmem:[%s5958_s3 + $0x790] sm:$0xff]  ;;  %v2662_v55 = vld [vmem:[%s5958_s3 + $0x798] sm:$0xff] }
 0x129   : > { %3630 = vmatpush3.bf16.msra.mxu0 %v3629_v61  ;;  %v2574_v61 = vld [vmem:[%s5958_s3 + $0x4d8] sm:$0xff]  ;;  %v3681_v2 = vpack.c.bf16 %v2556_v58, %v2555_v57  ;;  %v2644_v52 = vld [vmem:[%s5958_s3 + $0x708] sm:$0xff]  ;;  %v3731_v57 = vpack.c.bf16 %v2630_v49, %v2629_v48  ;;  %v2613_v58 = vld [vmem:[%s5958_s3 + $0x610] sm:$0xff] }
 0x12a   : > { %3664 = vmatprep.subr.bf16.mxu0 %v3663_v1  ;;  %v2588_v1 = vld [vmem:[%s5958_s3 + $0x548] sm:$0xff]  ;;  %v3683_v6 = vpack.c.bf16 %v2574_v61, %v2573_v60  ;;  %v1316_v60 = vrot.slane %v4553_v27, 6  ;;  %v3761_v61 = vpack.c.bf16 %v2644_v52, %v2643_v51  ;;  %v2621_v48 = vld [vmem:[%s5958_s3 + $0x650] sm:$0xff]  ;;  %v2622_v49 = vld [vmem:[%s5958_s3 + $0x658] sm:$0xff] }
 0x12b   : > { %3662 = vmatpush3.bf16.msra.mxu1 %v3661_v5  ;;  %v2606_v5 = vld [vmem:[%s5958_s3 + $0x5d8] sm:$0xff]  ;;  %v3713_v9 = vpack.c.bf16 %v2588_v1, %v2587_v63  ;;  %v2632_v63 = vld [vmem:[%s5958_s3 + $0x6a8] sm:$0xff]  ;;  %v1207_v1 = vrot.slane %v4545_v23, 5  ;;  %v2639_v51 = vld [vmem:[%s5958_s3 + $0x6e0] sm:$0xff] }
 0x12c   : > { %952 = vmatmul.mubr.f32.vlgmr.msra.gmra.mrb[10].mxu0 %v883_v13  ;;  %3696 = vmatprep.subr.bf16.mxu1 %v3695_v8  ;;  %v2558_v8 = vld [vmem:[%s5958_s3 + $0x458] sm:$0xff]  ;;  %v3715_v4 = vpack.c.bf16 %v2606_v5, %v2605_v3  ;;  %v2645_v3 = vld [vmem:[%s5958_s3 + $0x710] sm:$0xff]  ;;  %v2640_v52 = vld [vmem:[%s5958_s3 + $0x6e8] sm:$0xff] }
 0x12d   : > { %3666 = vmatpush3.bf16.msra.mxu0 %v3665_v11  ;;  %1167 = vmatprep.mubr.f32.mxu0 %v1100_v17  ;;  %v2576_v11 = vld [vmem:[%s5958_s3 + $0x4e8] sm:$0xff]  ;;  %v2590_v13 = vld [vmem:[%s5958_s3 + $0x558] sm:$0xff] }
 0x12e   : > { %1060 = vmatmul.mubr.f32.vlgmr.msra.gmra.mrb[10].mxu1 %v991_v21  ;;  %3668 = vmatprep.subr.bf16.mxu0 %v3667_v14  ;;  %v3685_v14 = vpack.c.bf16 %v2558_v8, %v2557_v7  ;;  %v3687_v17 = vpack.c.bf16 %v2576_v11, %v2575_v10  ;;  %v3717_v20 = vpack.c.bf16 %v2590_v13, %v2589_v12  ;;  %v2577_v21 = vld [vmem:[%s5958_s3 + $0x4f0] sm:$0xff]  ;;  %v2646_v5 = vld [vmem:[%s5958_s3 + $0x718] sm:$0xff]  ;;  %v2663_v8 = vld [vmem:[%s5958_s3 + $0x7a0] sm:$0xff] }
 0x12f   : > { %3698 = vmatpush3.bf16.msra.mxu1 %v3697_v18  ;;  %1275 = vmatprep.mubr.f32.mxu1 %v1208_v25  ;;  %v2559_v18 = vld [vmem:[%s5958_s3 + $0x460] sm:$0xff]  ;;  %v2592_v25 = vld [vmem:[%s5958_s3 + $0x568] sm:$0xff]  ;;  %v2633_v12 = vld [vmem:[%s5958_s3 + $0x6b0] sm:$0xff] }
 0x130   : > { %3700 = vmatprep.subr.bf16.mxu1 %v3699_v22  ;;  %v2578_v22 = vld [vmem:[%s5958_s3 + $0x4f8] sm:$0xff]  ;;  %v2615_v11 = vld [vmem:[%s5958_s3 + $0x620] sm:$0xff] }
 0x131   : > { %3670 = vmatpush3.bf16.msra.mxu0 %v3669_v26  ;;  %v3689_v26 = vpack.c.bf16 %v2560_v19, %v2559_v18  ;;  %v2634_v13 = vld [vmem:[%s5958_s3 + $0x6b8] sm:$0xff]  ;;  %v2665_v18 = vld [vmem:[%s5958_s3 + $0x7b0] sm:$0xff] }
 0x132   : > { %3672 = vmatprep.subr.bf16.mxu0 %v3671_v30  ;;  %v3691_v30 = vpack.c.bf16 %v2578_v22, %v2577_v21  ;;  %v2666_v19 = vld [vmem:[%s5958_s3 + $0x7b8] sm:$0xff]  ;;  %v2617_v21 = vld [vmem:[%s5958_s3 + $0x630] sm:$0xff] }
 0x133   : > { %3702 = vmatpush3.bf16.msra.mxu1 %v3701_v33  ;;  %v3721_v33 = vpack.c.bf16 %v2592_v25, %v2591_v24  ;;  %v2618_v22 = vld [vmem:[%s5958_s3 + $0x638] sm:$0xff]  ;;  %v2635_v24 = vld [vmem:[%s5958_s3 + $0x6c0] sm:$0xff]  ;;  %v2636_v25 = vld [vmem:[%s5958_s3 + $0x6c8] sm:$0xff] }
 0x134   : > { %3704 = vmatprep.subr.bf16.mxu1 %v3703_v36  ;;  %v3723_v36 = vpack.c.bf16 %v2610_v29, %v2609_v28  ;;  %v2649_v28 = vld [vmem:[%s5958_s3 + $0x730] sm:$0xff]  ;;  %v2650_v29 = vld [vmem:[%s5958_s3 + $0x738] sm:$0xff] }
 0x135   : > { %3674 = vmatpush3.bf16.msra.mxu0 %v3673_v39  ;;  %v3693_v39 = vpack.c.bf16 %v2562_v32, %v2561_v31  ;;  %v2667_v31 = vld [vmem:[%s5958_s3 + $0x7c0] sm:$0xff]  ;;  %v2668_v32 = vld [vmem:[%s5958_s3 + $0x7c8] sm:$0xff] }
 0x136   : > { %3676 = vmatprep.subr.bf16.mxu0 %v3675_v43  ;;  %v3727_v43 = vpack.c.bf16 %v2628_v35, %v2627_v34  ;;  %v2619_v34 = vld [vmem:[%s5958_s3 + $0x640] sm:$0xff]  ;;  %v2620_v35 = vld [vmem:[%s5958_s3 + $0x648] sm:$0xff] }
 0x137   : > { %3706 = vmatpush3.bf16.msra.mxu1 %v3705_v46  ;;  %v3725_v46 = vpack.c.bf16 %v2594_v38, %v2593_v37  ;;  %v2637_v37 = vld [vmem:[%s5958_s3 + $0x6d0] sm:$0xff]  ;;  %v2638_v38 = vld [vmem:[%s5958_s3 + $0x6d8] sm:$0xff] }
 0x138   : > { %3708 = vmatprep.subr.bf16.mxu1 %v3707_v50  ;;  %v3759_v50 = vpack.c.bf16 %v2660_v41, %v2659_v40  ;;  %v2651_v40 = vld [vmem:[%s5958_s3 + $0x740] sm:$0xff]  ;;  %v2652_v41 = vld [vmem:[%s5958_s3 + $0x748] sm:$0xff] }
 0x139   : > { %3678 = vmatpush3.bf16.msra.mxu0 %v3677_v53  ;;  %v3729_v53 = vpack.c.bf16 %v2612_v45, %v2611_v44  ;;  %v2669_v44 = vld [vmem:[%s5958_s3 + $0x7d0] sm:$0xff]  ;;  %v2670_v45 = vld [vmem:[%s5958_s3 + $0x7d8] sm:$0xff] }
 0x13a   : > { %3680 = vmatprep.subr.bf16.mxu0 %v3679_v56  ;;  %v1099_v56 = vrot.slane %v4545_v23, 4 }
 0x13b   : > { %3710 = vmatpush3.bf16.msra.mxu1 %v3709_v59  ;;  %v2614_v59 = vld [vmem:[%s5958_s3 + $0x618] sm:$0xff] }
 0x13c   : > { %3712 = vmatprep.subr.bf16.mxu1 %v3711_v62  ;;  %v2631_v62 = vld [vmem:[%s5958_s3 + $0x6a0] sm:$0xff]  ;;  %v3733_v7 = vpack.c.bf16 %v2614_v59, %v2613_v58  ;;  %v2672_v58 = vld [vmem:[%s5958_s3 + $0x7e8] sm:$0xff]  ;;  %v3751_v59 = vpack.c.bf16 %v2640_v52, %v2639_v51  ;;  %v2697_v52 = vld [vmem:[%s5958_s3 + $0x8b0] sm:$0xff] }
 0x13d   : > { %3682 = vmatpush3.bf16.msra.mxu0 %v3681_v2  ;;  %v3763_v2 = vpack.c.bf16 %v2662_v55, %v2661_v54  ;;  %v3735_v10 = vpack.c.bf16 %v2632_v63, %v2631_v62  ;;  %v2653_v54 = vld [vmem:[%s5958_s3 + $0x750] sm:$0xff]  ;;  %v2654_v55 = vld [vmem:[%s5958_s3 + $0x758] sm:$0xff] }
 0x13e   : > { %3684 = vmatprep.subr.bf16.mxu0 %v3683_v6  ;;  %v1424_v6 = vrot.slane %v4553_v27, 7  ;;  %v2616_v27 = vld [vmem:[%s5958_s3 + $0x628] sm:$0xff]  ;;  %v3781_v62 = vpack.c.bf16 %v2654_v55, %v2653_v54  ;;  %v2641_v63 = vld [vmem:[%s5958_s3 + $0x6f0] sm:$0xff]  ;;  %v2711_v55 = vld [vmem:[%s5958_s3 + $0x920] sm:$0xff] }
 0x13f   : > { %3714 = vmatpush3.bf16.msra.mxu1 %v3713_v9  ;;  %v2664_v9 = vld [vmem:[%s5958_s3 + $0x7a8] sm:$0xff] }
 0x140   : > { %3716 = vmatprep.subr.bf16.mxu1 %v3715_v4  ;;  %v3765_v4 = vpack.c.bf16 %v2646_v5, %v2645_v3  ;;  %v2655_v3 = vld [vmem:[%s5958_s3 + $0x760] sm:$0xff]  ;;  %v2656_v5 = vld [vmem:[%s5958_s3 + $0x768] sm:$0xff] }
 0x141   : > { %3686 = vmatpush3.bf16.msra.mxu0 %v3685_v14  ;;  %v3767_v14 = vpack.c.bf16 %v2664_v9, %v2663_v8  ;;  %v2674_v8 = vld [vmem:[%s5958_s3 + $0x7f8] sm:$0xff] }
 0x142   : > { %3688 = vmatprep.subr.bf16.mxu0 %v3687_v17  ;;  %v3737_v17 = vpack.c.bf16 %v2616_v27, %v2615_v11  ;;  %v2626_v11 = vld [vmem:[%s5958_s3 + $0x678] sm:$0xff]  ;;  %v3785_v27 = vpack.c.bf16 %v2656_v5, %v2655_v3  ;;  %v2713_v5 = vld [vmem:[%s5958_s3 + $0x930] sm:$0xff] }
 0x143   : > { %3718 = vmatpush3.bf16.msra.mxu1 %v3717_v20  ;;  %v3739_v20 = vpack.c.bf16 %v2634_v13, %v2633_v12  ;;  %v2692_v12 = vld [vmem:[%s5958_s3 + $0x888] sm:$0xff] }
 0x144   : > { %3720 = vmatprep.subr.bf16.mxu1 %v3719_v0  ;;  %v3769_v0 = vpack.c.bf16 %v2648_v16, %v2647_v15  ;;  %v2658_v15 = vld [vmem:[%s5958_s3 + $0x778] sm:$0xff] }
 0x145   : > { %3690 = vmatpush3.bf16.msra.mxu0 %v3689_v26  ;;  %v3771_v26 = vpack.c.bf16 %v2666_v19, %v2665_v18  ;;  %v2724_v18 = vld [vmem:[%s5958_s3 + $0x988] sm:$0xff] }
 0x146   : > { %3692 = vmatprep.subr.bf16.mxu0 %v3691_v30  ;;  %v3741_v30 = vpack.c.bf16 %v2618_v22, %v2617_v21  ;;  %v2676_v21 = vld [vmem:[%s5958_s3 + $0x808] sm:$0xff] }
 0x147   : > { %3722 = vmatpush3.bf16.msra.mxu1 %v3721_v33  ;;  %v3743_v33 = vpack.c.bf16 %v2636_v25, %v2635_v24  ;;  %v2694_v24 = vld [vmem:[%s5958_s3 + $0x898] sm:$0xff] }
 0x148   : > { %3724 = vmatprep.subr.bf16.mxu1 %v3723_v36  ;;  %v3773_v36 = vpack.c.bf16 %v2650_v29, %v2649_v28  ;;  %v2708_v28 = vld [vmem:[%s5958_s3 + $0x908] sm:$0xff] }
 0x149   : > { %3694 = vmatpush3.bf16.msra.mxu0 %v3693_v39  ;;  %v3775_v39 = vpack.c.bf16 %v2668_v32, %v2667_v31  ;;  %v2726_v31 = vld [vmem:[%s5958_s3 + $0x998] sm:$0xff]  ;;  %v1315_v32 = vrot.slane %v4545_v23, 6 }
 0x14a   : > { %3728 = vmatprep.subr.bf16.mxu0 %v3727_v43  ;;  %v3745_v43 = vpack.c.bf16 %v2620_v35, %v2619_v34  ;;  %v2677_v34 = vld [vmem:[%s5958_s3 + $0x810] sm:$0xff]  ;;  %v2678_v35 = vld [vmem:[%s5958_s3 + $0x818] sm:$0xff] }
 0x14b   : > { %3726 = vmatpush3.bf16.msra.mxu1 %v3725_v46  ;;  %v3747_v46 = vpack.c.bf16 %v2638_v38, %v2637_v37  ;;  %v2695_v37 = vld [vmem:[%s5958_s3 + $0x8a0] sm:$0xff]  ;;  %v2696_v38 = vld [vmem:[%s5958_s3 + $0x8a8] sm:$0xff] }
 0x14c   : > { %1168 = vmatmul.mubr.f32.vlgmr.msra.gmra.mrb[12].mxu0 %v1099_v56  ;;  %3760 = vmatprep.subr.bf16.mxu1 %v3759_v50  ;;  %v3777_v50 = vpack.c.bf16 %v2652_v41, %v2651_v40  ;;  %v3749_v56 = vpack.c.bf16 %v2622_v49, %v2621_v48  ;;  %v2709_v41 = vld [vmem:[%s5958_s3 + $0x910] sm:$0xff]  ;;  %v3799_v48 = vpack.c.bf16 %v2696_v38, %v2695_v37  ;;  %v2679_v49 = vld [vmem:[%s5958_s3 + $0x820] sm:$0xff]  ;;  %v2706_v38 = vld [vmem:[%s5958_s3 + $0x8f8] sm:$0xff] }
 0x14d   : > { %3730 = vmatpush3.bf16.msra.mxu0 %v3729_v53  ;;  %1383 = vmatprep.mubr.f32.mxu0 %v1316_v60  ;;  %v3779_v53 = vpack.c.bf16 %v2670_v45, %v2669_v44  ;;  %v2623_v60 = vld [vmem:[%s5958_s3 + $0x660] sm:$0xff]  ;;  %v1638_v44 = vrot.slane %v4586_v47, 1  ;;  %v3797_v45 = vpack.c.bf16 %v2678_v35, %v2677_v34  ;;  %v2688_v35 = vld [vmem:[%s5958_s3 + $0x868] sm:$0xff]  ;;  %v2705_v37 = vld [vmem:[%s5958_s3 + $0x8f0] sm:$0xff] }
 0x14e   : > { %1276 = vmatmul.mubr.f32.vlgmr.msra.gmra.mrb[12].mxu1 %v1207_v1  ;;  %3732 = vmatprep.subr.bf16.mxu0 %v3731_v57  ;;  %v2671_v57 = vld [vmem:[%s5958_s3 + $0x7e0] sm:$0xff]  ;;  %v2642_v1 = vld [vmem:[%s5958_s3 + $0x6f8] sm:$0xff] }
 0x14f   : > { %3762 = vmatpush3.bf16.msra.mxu1 %v3761_v61  ;;  %1491 = vmatprep.mubr.f32.mxu1 %v1424_v6  ;;  %v2624_v61 = vld [vmem:[%s5958_s3 + $0x668] sm:$0xff]  ;;  %v3755_v9 = vpack.c.bf16 %v2642_v1, %v2641_v63  ;;  %v2699_v1 = vld [vmem:[%s5958_s3 + $0x8c0] sm:$0xff] }
 0x150   : > { %3764 = vmatprep.subr.bf16.mxu1 %v3763_v2  ;;  %v3783_v2 = vpack.c.bf16 %v2672_v58, %v2671_v57  ;;  %v3753_v6 = vpack.c.bf16 %v2624_v61, %v2623_v60  ;;  %v2729_v58 = vld [vmem:[%s5958_s3 + $0x9b0] sm:$0xff]  ;;  %v2687_v34 = vld [vmem:[%s5958_s3 + $0x860] sm:$0xff] }
 0x151   : > { %3734 = vmatpush3.bf16.msra.mxu0 %v3733_v7  ;;  %v2673_v7 = vld [vmem:[%s5958_s3 + $0x7f0] sm:$0xff] }
 0x152   : > { %3736 = vmatprep.subr.bf16.mxu0 %v3735_v10  ;;  %v2625_v10 = vld [vmem:[%s5958_s3 + $0x670] sm:$0xff]  ;;  %v3787_v13 = vpack.c.bf16 %v2674_v8, %v2673_v7  ;;  %v2731_v8 = vld [vmem:[%s5958_s3 + $0x9c0] sm:$0xff] }
 0x153   : > { %3766 = vmatpush3.bf16.msra.mxu1 %v3765_v4  ;;  %v2691_v4 = vld [vmem:[%s5958_s3 + $0x880] sm:$0xff]  ;;  %v3757_v16 = vpack.c.bf16 %v2626_v11, %v2625_v10  ;;  %v2681_v61 = vld [vmem:[%s5958_s3 + $0x830] sm:$0xff] }
 0x154   : > { %3768 = vmatprep.subr.bf16.mxu1 %v3767_v14  ;;  %v2657_v14 = vld [vmem:[%s5958_s3 + $0x770] sm:$0xff]  ;;  %v3791_v19 = vpack.c.bf16 %v2692_v12, %v2691_v4  ;;  %v2683_v11 = vld [vmem:[%s5958_s3 + $0x840] sm:$0xff] }
 0x155   : > { %3738 = vmatpush3.bf16.msra.mxu0 %v3737_v17  ;;  %v2723_v17 = vld [vmem:[%s5958_s3 + $0x980] sm:$0xff]  ;;  %v3789_v22 = vpack.c.bf16 %v2658_v15, %v2657_v14  ;;  %v2701_v12 = vld [vmem:[%s5958_s3 + $0x8d0] sm:$0xff] }
 0x156   : > { %3740 = vmatprep.subr.bf16.mxu0 %v3739_v20  ;;  %v2675_v20 = vld [vmem:[%s5958_s3 + $0x800] sm:$0xff]  ;;  %v3823_v25 = vpack.c.bf16 %v2724_v18, %v2723_v17  ;;  %v2733_v18 = vld [vmem:[%s5958_s3 + $0x9d0] sm:$0xff] }
 0x157   : > { %3770 = vmatpush3.bf16.msra.mxu1 %v3769_v0  ;;  %v2693_v0 = vld [vmem:[%s5958_s3 + $0x890] sm:$0xff]  ;;  %v3793_v29 = vpack.c.bf16 %v2676_v21, %v2675_v20  ;;  %v2715_v15 = vld [vmem:[%s5958_s3 + $0x940] sm:$0xff] }
 0x158   : > { %3772 = vmatprep.subr.bf16.mxu1 %v3771_v26  ;;  %v2707_v26 = vld [vmem:[%s5958_s3 + $0x900] sm:$0xff]  ;;  %v2685_v21 = vld [vmem:[%s5958_s3 + $0x850] sm:$0xff] }
 0x159   : > { %3742 = vmatpush3.bf16.msra.mxu0 %v3741_v30  ;;  %v2725_v30 = vld [vmem:[%s5958_s3 + $0x990] sm:$0xff] }
 0x15a   : > { %3744 = vmatprep.subr.bf16.mxu0 %v3743_v33  ;;  %v3795_v33 = vpack.c.bf16 %v2694_v24, %v2693_v0  ;;  %v3827_v40 = vpack.c.bf16 %v2726_v31, %v2725_v30  ;;  %v2703_v24 = vld [vmem:[%s5958_s3 + $0x8e0] sm:$0xff] }
 0x15b   : > { %3774 = vmatpush3.bf16.msra.mxu1 %v3773_v36  ;;  %v3825_v36 = vpack.c.bf16 %v2708_v28, %v2707_v26  ;;  %v2717_v28 = vld [vmem:[%s5958_s3 + $0x950] sm:$0xff]  ;;  %v2735_v31 = vld [vmem:[%s5958_s3 + $0x9e0] sm:$0xff] }
 0x15c   : > { %3776 = vmatprep.subr.bf16.mxu1 %v3775_v39  ;;  %v1423_v39 = vrot.slane %v4545_v23, 7  ;;  %v2727_v23 = vld [vmem:[%s5958_s3 + $0x9a0] sm:$0xff] }
 0x15d   : > { %3746 = vmatpush3.bf16.msra.mxu0 %v3745_v43  ;;  %v2710_v43 = vld [vmem:[%s5958_s3 + $0x918] sm:$0xff] }
 0x15e   : > { %3748 = vmatprep.subr.bf16.mxu0 %v3747_v46  ;;  %v2728_v46 = vld [vmem:[%s5958_s3 + $0x9a8] sm:$0xff]  ;;  %v3829_v51 = vpack.c.bf16 %v2710_v43, %v2709_v41  ;;  %v3817_v43 = vpack.c.bf16 %v2688_v35, %v2687_v34  ;;  %v2745_v35 = vld [vmem:[%s5958_s3 + $0xa30] sm:$0xff] }
 0x15f   : > { %3778 = vmatpush3.bf16.msra.mxu1 %v3777_v50  ;;  %v2680_v50 = vld [vmem:[%s5958_s3 + $0x828] sm:$0xff]  ;;  %v3831_v54 = vpack.c.bf16 %v2728_v46, %v2727_v23  ;;  %v3819_v23 = vpack.c.bf16 %v2706_v38, %v2705_v37  ;;  %v2689_v46 = vld [vmem:[%s5958_s3 + $0x870] sm:$0xff]  ;;  %v2763_v38 = vld [vmem:[%s5958_s3 + $0xac0] sm:$0xff] }
 0x160   : > { %3780 = vmatprep.subr.bf16.mxu1 %v3779_v53  ;;  %v2698_v53 = vld [vmem:[%s5958_s3 + $0x8b8] sm:$0xff]  ;;  %v3801_v57 = vpack.c.bf16 %v2680_v50, %v2679_v49  ;;  %v2720_v41 = vld [vmem:[%s5958_s3 + $0x968] sm:$0xff]  ;;  %v2755_v50 = vld [vmem:[%s5958_s3 + $0xa80] sm:$0xff] }
 0x161   : > { %3750 = vmatpush3.bf16.msra.mxu0 %v3749_v56  ;;  %v2712_v56 = vld [vmem:[%s5958_s3 + $0x928] sm:$0xff]  ;;  %v3803_v60 = vpack.c.bf16 %v2698_v53, %v2697_v52  ;;  %v2721_v53 = vld [vmem:[%s5958_s3 + $0x970] sm:$0xff] }
 0x162   : > { %3752 = vmatprep.subr.bf16.mxu0 %v3751_v59  ;;  %v2730_v59 = vld [vmem:[%s5958_s3 + $0x9b8] sm:$0xff]  ;;  %v3833_v63 = vpack.c.bf16 %v2712_v56, %v2711_v55  ;;  %v2787_v56 = vld [vmem:[%s5958_s3 + $0xb80] sm:$0xff] }
 0x163   : > { %3782 = vmatpush3.bf16.msra.mxu1 %v3781_v62  ;;  %v2682_v62 = vld [vmem:[%s5958_s3 + $0x838] sm:$0xff]  ;;  %v3835_v3 = vpack.c.bf16 %v2730_v59, %v2729_v58  ;;  %v2739_v59 = vld [vmem:[%s5958_s3 + $0xa00] sm:$0xff] }
 0x164   : > { %3784 = vmatprep.subr.bf16.mxu1 %v3783_v2  ;;  %v2700_v2 = vld [vmem:[%s5958_s3 + $0x8c8] sm:$0xff]  ;;  %v3805_v7 = vpack.c.bf16 %v2682_v62, %v2681_v61  ;;  %v2757_v62 = vld [vmem:[%s5958_s3 + $0xa90] sm:$0xff] }
 0x165   : > { %3754 = vmatpush3.bf16.msra.mxu0 %v3753_v6  ;;  %v2714_v6 = vld [vmem:[%s5958_s3 + $0x938] sm:$0xff]  ;;  %v3807_v10 = vpack.c.bf16 %v2700_v2, %v2699_v1  ;;  %v2771_v2 = vld [vmem:[%s5958_s3 + $0xb00] sm:$0xff] }
 0x166   : > { %3756 = vmatprep.subr.bf16.mxu0 %v3755_v9  ;;  %v2732_v9 = vld [vmem:[%s5958_s3 + $0x9c8] sm:$0xff]  ;;  %v3837_v4 = vpack.c.bf16 %v2714_v6, %v2713_v5  ;;  %v2789_v6 = vld [vmem:[%s5958_s3 + $0xb90] sm:$0xff] }
 0x167   : > { %3786 = vmatpush3.bf16.msra.mxu1 %v3785_v27  ;;  %v2684_v27 = vld [vmem:[%s5958_s3 + $0x848] sm:$0xff]  ;;  %v3839_v14 = vpack.c.bf16 %v2732_v9, %v2731_v8  ;;  %v2741_v9 = vld [vmem:[%s5958_s3 + $0xa10] sm:$0xff] }
 0x168   : > { %3788 = vmatprep.subr.bf16.mxu1 %v3787_v13  ;;  %v2702_v13 = vld [vmem:[%s5958_s3 + $0x8d8] sm:$0xff]  ;;  %v3809_v17 = vpack.c.bf16 %v2684_v27, %v2683_v11  ;;  %v1746_v11 = vrot.slane %v4586_v47, 2 }
 0x169   : > { %3758 = vmatpush3.bf16.msra.mxu0 %v3757_v16  ;;  %v2716_v16 = vld [vmem:[%s5958_s3 + $0x948] sm:$0xff]  ;;  %v3811_v20 = vpack.c.bf16 %v2702_v13, %v2701_v12  ;;  %v1637_v13 = vrot.slane %v4576_v42, 1 }
 0x16a   : > { %3792 = vmatprep.subr.bf16.mxu0 %v3791_v19  ;;  %v2734_v19 = vld [vmem:[%s5958_s3 + $0x9d8] sm:$0xff]  ;;  %v3841_v0 = vpack.c.bf16 %v2716_v16, %v2715_v15  ;;  %v2760_v12 = vld [vmem:[%s5958_s3 + $0xaa8] sm:$0xff]  ;;  %v2773_v15 = vld [vmem:[%s5958_s3 + $0xb10] sm:$0xff] }
 0x16b   : > { %3790 = vmatpush3.bf16.msra.mxu1 %v3789_v22  ;;  %v2686_v22 = vld [vmem:[%s5958_s3 + $0x858] sm:$0xff]  ;;  %v3843_v26 = vpack.c.bf16 %v2734_v19, %v2733_v18  ;;  %v2791_v19 = vld [vmem:[%s5958_s3 + $0xba0] sm:$0xff] }
 0x16c   : > { %1384 = vmatmul.mubr.f32.vlgmr.msra.gmra.mrb[14].mxu0 %v1315_v32  ;;  %3824 = vmatprep.subr.bf16.mxu1 %v3823_v25  ;;  %v2704_v25 = vld [vmem:[%s5958_s3 + $0x8e8] sm:$0xff]  ;;  %v3813_v30 = vpack.c.bf16 %v2686_v22, %v2685_v21  ;;  %v2774_v16 = vld [vmem:[%s5958_s3 + $0xb18] sm:$0xff]  ;;  %v2743_v22 = vld [vmem:[%s5958_s3 + $0xa20] sm:$0xff] }
 0x16d   : > { %3794 = vmatpush3.bf16.msra.mxu0 %v3793_v29  ;;  %1595 = vmatprep.mubr.f32.mxu0 %v4586_v47  ;;  %v2718_v29 = vld [vmem:[%s5958_s3 + $0x958] sm:$0xff]  ;;  %v2736_v32 = vld [vmem:[%s5958_s3 + $0x9e8] sm:$0xff] }
 0x16e   : > { %1492 = vmatmul.mubr.f32.vlgmr.msra.gmra.mrb[14].mxu1 %v1423_v39  ;;  %3796 = vmatprep.subr.bf16.mxu0 %v3795_v33  ;;  %v3815_v33 = vpack.c.bf16 %v2704_v25, %v2703_v24  ;;  %v3847_v39 = vpack.c.bf16 %v2736_v32, %v2735_v31  ;;  %v3893_v24 = vpack.c.bf16 %v2774_v16, %v2773_v15  ;;  %v2761_v25 = vld [vmem:[%s5958_s3 + $0xab0] sm:$0xff]  ;;  %v2784_v15 = vld [vmem:[%s5958_s3 + $0xb68] sm:$0xff] }
 0x16f   : > { %3826 = vmatpush3.bf16.msra.mxu1 %v3825_v36  ;;  %1705 = vmatprep.mubr.f32.mxu1 %v1638_v44  ;;  %v3845_v36 = vpack.c.bf16 %v2718_v29, %v2717_v28  ;;  %v2737_v44 = vld [vmem:[%s5958_s3 + $0x9f0] sm:$0xff]  ;;  %v2775_v29 = vld [vmem:[%s5958_s3 + $0xb20] sm:$0xff] }
 0x170   : > { %3828 = vmatprep.subr.bf16.mxu1 %v3827_v40  ;;  %v2719_v40 = vld [vmem:[%s5958_s3 + $0x960] sm:$0xff]  ;;  %v2793_v32 = vld [vmem:[%s5958_s3 + $0xbb0] sm:$0xff] }
 0x171   : > { %3798 = vmatpush3.bf16.msra.mxu0 %v3797_v45  ;;  %v2738_v45 = vld [vmem:[%s5958_s3 + $0x9f8] sm:$0xff]  ;;  %v3849_v49 = vpack.c.bf16 %v2720_v41, %v2719_v40  ;;  %v2777_v41 = vld [vmem:[%s5958_s3 + $0xb30] sm:$0xff] }
 0x172   : > { %3800 = vmatprep.subr.bf16.mxu0 %v3799_v48  ;;  %v2690_v48 = vld [vmem:[%s5958_s3 + $0x878] sm:$0xff]  ;;  %v3851_v52 = vpack.c.bf16 %v2738_v45, %v2737_v44  ;;  %v2795_v45 = vld [vmem:[%s5958_s3 + $0xbc0] sm:$0xff] }
 0x173   : > { %3830 = vmatpush3.bf16.msra.mxu1 %v3829_v51  ;;  %v2756_v51 = vld [vmem:[%s5958_s3 + $0xa88] sm:$0xff]  ;;  %v3821_v55 = vpack.c.bf16 %v2690_v48, %v2689_v46  ;;  %v2747_v48 = vld [vmem:[%s5958_s3 + $0xa40] sm:$0xff] }
 0x174   : > { %3832 = vmatprep.subr.bf16.mxu1 %v3831_v54  ;;  %v2722_v54 = vld [vmem:[%s5958_s3 + $0x978] sm:$0xff]  ;;  %v3855_v58 = vpack.c.bf16 %v2756_v51, %v2755_v50  ;;  %v2765_v51 = vld [vmem:[%s5958_s3 + $0xad0] sm:$0xff] }
 0x175   : > { %3802 = vmatpush3.bf16.msra.mxu0 %v3801_v57  ;;  %v2788_v57 = vld [vmem:[%s5958_s3 + $0xb88] sm:$0xff]  ;;  %v3853_v61 = vpack.c.bf16 %v2722_v54, %v2721_v53  ;;  %v2779_v54 = vld [vmem:[%s5958_s3 + $0xb40] sm:$0xff] }
 0x176   : > { %3804 = vmatprep.subr.bf16.mxu0 %v3803_v60  ;;  %v2740_v60 = vld [vmem:[%s5958_s3 + $0xa08] sm:$0xff]  ;;  %v3887_v1 = vpack.c.bf16 %v2788_v57, %v2787_v56  ;;  %v2797_v57 = vld [vmem:[%s5958_s3 + $0xbd0] sm:$0xff] }
 0x177   : > { %3834 = vmatpush3.bf16.msra.mxu1 %v3833_v63  ;;  %v2758_v63 = vld [vmem:[%s5958_s3 + $0xa98] sm:$0xff]  ;;  %v3857_v5 = vpack.c.bf16 %v2740_v60, %v2739_v59  ;;  %v2749_v60 = vld [vmem:[%s5958_s3 + $0xa50] sm:$0xff] }
 0x178   : > { %3836 = vmatprep.subr.bf16.mxu1 %v3835_v3  ;;  %v2772_v3 = vld [vmem:[%s5958_s3 + $0xb08] sm:$0xff]  ;;  %v3859_v8 = vpack.c.bf16 %v2758_v63, %v2757_v62  ;;  %v2767_v63 = vld [vmem:[%s5958_s3 + $0xae0] sm:$0xff] }
 0x179   : > { %3806 = vmatpush3.bf16.msra.mxu0 %v3805_v7  ;;  %v2790_v7 = vld [vmem:[%s5958_s3 + $0xb98] sm:$0xff]  ;;  %v3889_v27 = vpack.c.bf16 %v2772_v3, %v2771_v2  ;;  %v2781_v3 = vld [vmem:[%s5958_s3 + $0xb50] sm:$0xff] }
 0x17a   : > { %3808 = vmatprep.subr.bf16.mxu0 %v3807_v10  ;;  %v2742_v10 = vld [vmem:[%s5958_s3 + $0xa18] sm:$0xff] }
 0x17b   : > { %3838 = vmatpush3.bf16.msra.mxu1 %v3837_v4  ;;  %v2759_v4 = vld [vmem:[%s5958_s3 + $0xaa0] sm:$0xff]  ;;  %v3861_v18 = vpack.c.bf16 %v2742_v10, %v2741_v9 }
 0x17c   : > { %3840 = vmatprep.subr.bf16.mxu1 %v3839_v14  ;;  %v3891_v14 = vpack.c.bf16 %v2790_v7, %v2789_v6  ;;  %v3863_v21 = vpack.c.bf16 %v2760_v12, %v2759_v4  ;;  %v2799_v7 = vld [vmem:[%s5958_s3 + $0xbe0] sm:$0xff]  ;;  %v2769_v4 = vld [vmem:[%s5958_s3 + $0xaf0] sm:$0xff]  ;;  %v2770_v12 = vld [vmem:[%s5958_s3 + $0xaf8] sm:$0xff] }
 0x17d   : > { %3810 = vmatpush3.bf16.msra.mxu0 %v3809_v17  ;;  %v1854_v17 = vrot.slane %v4586_v47, 3  ;;  %v2751_v10 = vld [vmem:[%s5958_s3 + $0xa60] sm:$0xff] }
 0x17e   : > { %3812 = vmatprep.subr.bf16.mxu0 %v3811_v20  ;;  %v2792_v20 = vld [vmem:[%s5958_s3 + $0xba8] sm:$0xff] }
 0x17f   : > { %3842 = vmatpush3.bf16.msra.mxu1 %v3841_v0  ;;  %v2744_v0 = vld [vmem:[%s5958_s3 + $0xa28] sm:$0xff]  ;;  %v3895_v28 = vpack.c.bf16 %v2792_v20, %v2791_v19  ;;  %v3883_v19 = vpack.c.bf16 %v2770_v12, %v2769_v4  ;;  %v2753_v20 = vld [vmem:[%s5958_s3 + $0xa70] sm:$0xff]  ;;  %v2810_v4 = vld [vmem:[%s5958_s3 + $0xc38] sm:$0xff] }
 0x180   : > { %3844 = vmatprep.subr.bf16.mxu1 %v3843_v26  ;;  %v2762_v26 = vld [vmem:[%s5958_s3 + $0xab8] sm:$0xff]  ;;  %v3865_v31 = vpack.c.bf16 %v2744_v0, %v2743_v22  ;;  %v2819_v0 = vld [vmem:[%s5958_s3 + $0xc80] sm:$0xff] }
 0x181   : > { %3814 = vmatpush3.bf16.msra.mxu0 %v3813_v30  ;;  %v2776_v30 = vld [vmem:[%s5958_s3 + $0xb28] sm:$0xff]  ;;  %v3867_v34 = vpack.c.bf16 %v2762_v26, %v2761_v25  ;;  %v2785_v26 = vld [vmem:[%s5958_s3 + $0xb70] sm:$0xff] }
 0x182   : > { %3816 = vmatprep.subr.bf16.mxu0 %v3815_v33  ;;  %v2794_v33 = vld [vmem:[%s5958_s3 + $0xbb8] sm:$0xff]  ;;  %v3897_v37 = vpack.c.bf16 %v2776_v30, %v2775_v29  ;;  %v2851_v30 = vld [vmem:[%s5958_s3 + $0xd80] sm:$0xff] }
 0x183   : > { %3846 = vmatpush3.bf16.msra.mxu1 %v3845_v36  ;;  %v2746_v36 = vld [vmem:[%s5958_s3 + $0xa38] sm:$0xff]  ;;  %v3899_v40 = vpack.c.bf16 %v2794_v33, %v2793_v32  ;;  %v2803_v33 = vld [vmem:[%s5958_s3 + $0xc00] sm:$0xff] }
 0x184   : > { %3848 = vmatprep.subr.bf16.mxu1 %v3847_v39  ;;  %v2764_v39 = vld [vmem:[%s5958_s3 + $0xac8] sm:$0xff]  ;;  %v3869_v44 = vpack.c.bf16 %v2746_v36, %v2745_v35  ;;  %v2821_v36 = vld [vmem:[%s5958_s3 + $0xc90] sm:$0xff] }
 0x185   : > { %3818 = vmatpush3.bf16.msra.mxu0 %v3817_v43  ;;  %v2778_v43 = vld [vmem:[%s5958_s3 + $0xb38] sm:$0xff]  ;;  %v3871_v46 = vpack.c.bf16 %v2764_v39, %v2763_v38  ;;  %v2835_v39 = vld [vmem:[%s5958_s3 + $0xd00] sm:$0xff] }
 0x186   : > { %3820 = vmatprep.subr.bf16.mxu0 %v3819_v23  ;;  %v2796_v23 = vld [vmem:[%s5958_s3 + $0xbc8] sm:$0xff]  ;;  %v3901_v50 = vpack.c.bf16 %v2778_v43, %v2777_v41  ;;  %v2853_v43 = vld [vmem:[%s5958_s3 + $0xd90] sm:$0xff] }
 0x187   : > { %3850 = vmatpush3.bf16.msra.mxu1 %v3849_v49  ;;  %v2748_v49 = vld [vmem:[%s5958_s3 + $0xa48] sm:$0xff]  ;;  %v3903_v53 = vpack.c.bf16 %v2796_v23, %v2795_v45  ;;  %v1745_v45 = vrot.slane %v4576_v42, 2 }
 0x188   : > { %3852 = vmatprep.subr.bf16.mxu1 %v3851_v52  ;;  %v2766_v52 = vld [vmem:[%s5958_s3 + $0xad8] sm:$0xff]  ;;  %v3873_v56 = vpack.c.bf16 %v2748_v49, %v2747_v48  ;;  %v1962_v49 = vrot.slane %v4586_v47, 4 }
 0x189   : > { %3822 = vmatpush3.bf16.msra.mxu0 %v3821_v55  ;;  %v2780_v55 = vld [vmem:[%s5958_s3 + $0xb48] sm:$0xff]  ;;  %v3875_v59 = vpack.c.bf16 %v2766_v52, %v2765_v51  ;;  %v2806_v48 = vld [vmem:[%s5958_s3 + $0xc18] sm:$0xff]  ;;  %v2823_v51 = vld [vmem:[%s5958_s3 + $0xca0] sm:$0xff] }
 0x18a   : > { %3856 = vmatprep.subr.bf16.mxu0 %v3855_v58  ;;  %v2798_v58 = vld [vmem:[%s5958_s3 + $0xbd8] sm:$0xff]  ;;  %v3905_v62 = vpack.c.bf16 %v2780_v55, %v2779_v54  ;;  %v2824_v52 = vld [vmem:[%s5958_s3 + $0xca8] sm:$0xff]  ;;  %v2837_v55 = vld [vmem:[%s5958_s3 + $0xd10] sm:$0xff] }
 0x18b   : > { %3854 = vmatpush3.bf16.msra.mxu1 %v3853_v61  ;;  %v2750_v61 = vld [vmem:[%s5958_s3 + $0xa58] sm:$0xff]  ;;  %v3907_v2 = vpack.c.bf16 %v2798_v58, %v2797_v57  ;;  %v2070_v57 = vrot.slane %v4586_v47, 5 }
 0x18c   : > { %1596 = vmatmul.mubr.f32.vlgmr.msra.gmra.mrb[16].mxu0 %v4576_v42  ;;  %3888 = vmatprep.subr.bf16.mxu1 %v3887_v1  ;;  %v2768_v1 = vld [vmem:[%s5958_s3 + $0xae8] sm:$0xff]  ;;  %v3877_v6 = vpack.c.bf16 %v2750_v61, %v2749_v60  ;;  %v3927_v61 = vpack.c.bf16 %v2824_v52, %v2823_v51  ;;  %v2833_v51 = vld [vmem:[%s5958_s3 + $0xcf0] sm:$0xff]  ;;  %v2834_v52 = vld [vmem:[%s5958_s3 + $0xcf8] sm:$0xff] }
 0x18d   : > { %3858 = vmatpush3.bf16.msra.mxu0 %v3857_v5  ;;  %1813 = vmatprep.mubr.f32.mxu0 %v1746_v11  ;;  %v2782_v5 = vld [vmem:[%s5958_s3 + $0xb58] sm:$0xff]  ;;  %v3879_v9 = vpack.c.bf16 %v2768_v1, %v2767_v63  ;;  %v2752_v11 = vld [vmem:[%s5958_s3 + $0xa68] sm:$0xff] }
 0x18e   : > { %1706 = vmatmul.mubr.f32.vlgmr.msra.gmra.mrb[16].mxu1 %v1637_v13  ;;  %3860 = vmatprep.subr.bf16.mxu0 %v3859_v8  ;;  %v2800_v8 = vld [vmem:[%s5958_s3 + $0xbe8] sm:$0xff]  ;;  %v3881_v16 = vpack.c.bf16 %v2752_v11, %v2751_v10  ;;  %v2858_v10 = vld [vmem:[%s5958_s3 + $0xdb8] sm:$0xff] }
 0x18f   : > { %3890 = vmatpush3.bf16.msra.mxu1 %v3889_v27  ;;  %1921 = vmatprep.mubr.f32.mxu1 %v1854_v17  ;;  %v3909_v27 = vpack.c.bf16 %v2782_v5, %v2781_v3  ;;  %v3911_v13 = vpack.c.bf16 %v2800_v8, %v2799_v7  ;;  %v2801_v17 = vld [vmem:[%s5958_s3 + $0xbf0] sm:$0xff]  ;;  %v2856_v60 = vld [vmem:[%s5958_s3 + $0xda8] sm:$0xff]  ;;  %v2826_v3 = vld [vmem:[%s5958_s3 + $0xcb8] sm:$0xff] }
 0x190   : > { %3892 = vmatprep.subr.bf16.mxu1 %v3891_v14  ;;  %v2783_v14 = vld [vmem:[%s5958_s3 + $0xb60] sm:$0xff]  ;;  %v2808_v63 = vld [vmem:[%s5958_s3 + $0xc28] sm:$0xff] }
 0x191   : > { %3862 = vmatpush3.bf16.msra.mxu0 %v3861_v18  ;;  %v2802_v18 = vld [vmem:[%s5958_s3 + $0xbf8] sm:$0xff]  ;;  %v3913_v22 = vpack.c.bf16 %v2784_v15, %v2783_v14  ;;  %v2840_v7 = vld [vmem:[%s5958_s3 + $0xd28] sm:$0xff] }
 0x192   : > { %3864 = vmatprep.subr.bf16.mxu0 %v3863_v21  ;;  %v2754_v21 = vld [vmem:[%s5958_s3 + $0xa78] sm:$0xff]  ;;  %v3915_v25 = vpack.c.bf16 %v2802_v18, %v2801_v17  ;;  %v2828_v14 = vld [vmem:[%s5958_s3 + $0xcc8] sm:$0xff] }
 0x193   : > { %3894 = vmatpush3.bf16.msra.mxu1 %v3893_v24  ;;  %v2820_v24 = vld [vmem:[%s5958_s3 + $0xc88] sm:$0xff]  ;;  %v3885_v29 = vpack.c.bf16 %v2754_v21, %v2753_v20  ;;  %v2842_v17 = vld [vmem:[%s5958_s3 + $0xd38] sm:$0xff] }
 0x194   : > { %3896 = vmatprep.subr.bf16.mxu1 %v3895_v28  ;;  %v2786_v28 = vld [vmem:[%s5958_s3 + $0xb78] sm:$0xff]  ;;  %v3919_v32 = vpack.c.bf16 %v2820_v24, %v2819_v0  ;;  %v2860_v20 = vld [vmem:[%s5958_s3 + $0xdc8] sm:$0xff] }
 0x195   : > { %3866 = vmatpush3.bf16.msra.mxu0 %v3865_v31  ;;  %v2852_v31 = vld [vmem:[%s5958_s3 + $0xd88] sm:$0xff]  ;;  %v3917_v35 = vpack.c.bf16 %v2786_v28, %v2785_v26  ;;  %v2830_v26 = vld [vmem:[%s5958_s3 + $0xcd8] sm:$0xff] }
 0x196   : > { %3868 = vmatprep.subr.bf16.mxu0 %v3867_v34  ;;  %v2804_v34 = vld [vmem:[%s5958_s3 + $0xc08] sm:$0xff]  ;;  %v3951_v38 = vpack.c.bf16 %v2852_v31, %v2851_v30 }
 0x197   : > { %3898 = vmatpush3.bf16.msra.mxu1 %v3897_v37  ;;  %v2822_v37 = vld [vmem:[%s5958_s3 + $0xc98] sm:$0xff]  ;;  %v3921_v41 = vpack.c.bf16 %v2804_v34, %v2803_v33  ;;  %v2812_v0 = vld [vmem:[%s5958_s3 + $0xc48] sm:$0xff] }
 0x198   : > { %3900 = vmatprep.subr.bf16.mxu1 %v3899_v40  ;;  %v2836_v40 = vld [vmem:[%s5958_s3 + $0xd08] sm:$0xff]  ;;  %v3923_v23 = vpack.c.bf16 %v2822_v37, %v2821_v36  ;;  %v2862_v33 = vld [vmem:[%s5958_s3 + $0xdd8] sm:$0xff] }
 0x199   : > { %3870 = vmatpush3.bf16.msra.mxu0 %v3869_v44  ;;  %v2854_v44 = vld [vmem:[%s5958_s3 + $0xd98] sm:$0xff]  ;;  %v2844_v30 = vld [vmem:[%s5958_s3 + $0xd48] sm:$0xff] }
 0x19a   : > { %3872 = vmatprep.subr.bf16.mxu0 %v3871_v46  ;;  %v2805_v46 = vld [vmem:[%s5958_s3 + $0xc10] sm:$0xff]  ;;  %v3955_v54 = vpack.c.bf16 %v2854_v44, %v2853_v43  ;;  %v2814_v36 = vld [vmem:[%s5958_s3 + $0xc58] sm:$0xff] }
 0x19b   : > { %3902 = vmatpush3.bf16.msra.mxu1 %v3901_v50  ;;  %v3953_v50 = vpack.c.bf16 %v2836_v40, %v2835_v39  ;;  %v3925_v58 = vpack.c.bf16 %v2806_v48, %v2805_v46  ;;  %v2832_v39 = vld [vmem:[%s5958_s3 + $0xce8] sm:$0xff]  ;;  %v2846_v43 = vld [vmem:[%s5958_s3 + $0xd58] sm:$0xff]  ;;  %v2815_v48 = vld [vmem:[%s5958_s3 + $0xc60] sm:$0xff] }
 0x19c   : > { %3904 = vmatprep.subr.bf16.mxu1 %v3903_v53  ;;  %v1853_v53 = vrot.slane %v4576_v42, 3 }
 0x19d   : > { %3874 = vmatpush3.bf16.msra.mxu0 %v3873_v56  ;;  %v2838_v56 = vld [vmem:[%s5958_s3 + $0xd18] sm:$0xff] }
 0x19e   : > { %3876 = vmatprep.subr.bf16.mxu0 %v3875_v59  ;;  %v2855_v59 = vld [vmem:[%s5958_s3 + $0xda0] sm:$0xff]  ;;  %v3957_v1 = vpack.c.bf16 %v2838_v56, %v2837_v55  ;;  %v2848_v55 = vld [vmem:[%s5958_s3 + $0xd68] sm:$0xff] }
 0x19f   : > { %3906 = vmatpush3.bf16.msra.mxu1 %v3905_v62  ;;  %v2807_v62 = vld [vmem:[%s5958_s3 + $0xc20] sm:$0xff]  ;;  %v3959_v5 = vpack.c.bf16 %v2856_v60, %v2855_v59  ;;  %v3947_v59 = vpack.c.bf16 %v2834_v52, %v2833_v51  ;;  %v2817_v60 = vld [vmem:[%s5958_s3 + $0xc70] sm:$0xff] }
 0x1a0   : > { %3908 = vmatprep.subr.bf16.mxu1 %v3907_v2  ;;  %v2825_v2 = vld [vmem:[%s5958_s3 + $0xcb0] sm:$0xff]  ;;  %v3929_v8 = vpack.c.bf16 %v2808_v63, %v2807_v62  ;;  %v2883_v63 = vld [vmem:[%s5958_s3 + $0xe80] sm:$0xff] }
 0x1a1   : > { %3878 = vmatpush3.bf16.msra.mxu0 %v3877_v6  ;;  %v2839_v6 = vld [vmem:[%s5958_s3 + $0xd20] sm:$0xff]  ;;  %v3931_v11 = vpack.c.bf16 %v2826_v3, %v2825_v2  ;;  %v2849_v3 = vld [vmem:[%s5958_s3 + $0xd70] sm:$0xff] }
 0x1a2   : > { %3880 = vmatprep.subr.bf16.mxu0 %v3879_v9  ;;  %v2857_v9 = vld [vmem:[%s5958_s3 + $0xdb0] sm:$0xff]  ;;  %v3961_v12 = vpack.c.bf16 %v2840_v7, %v2839_v6  ;;  %v2915_v7 = vld [vmem:[%s5958_s3 + $0xf80] sm:$0xff] }
 0x1a3   : > { %3910 = vmatpush3.bf16.msra.mxu1 %v3909_v27  ;;  %v2809_v27 = vld [vmem:[%s5958_s3 + $0xc30] sm:$0xff]  ;;  %v3963_v15 = vpack.c.bf16 %v2858_v10, %v2857_v9  ;;  %v2867_v10 = vld [vmem:[%s5958_s3 + $0xe00] sm:$0xff] }
 0x1a4   : > { %3912 = vmatprep.subr.bf16.mxu1 %v3911_v13  ;;  %v2827_v13 = vld [vmem:[%s5958_s3 + $0xcc0] sm:$0xff]  ;;  %v3933_v18 = vpack.c.bf16 %v2810_v4, %v2809_v27  ;;  %v2885_v4 = vld [vmem:[%s5958_s3 + $0xe90] sm:$0xff] }
 0x1a5   : > { %3882 = vmatpush3.bf16.msra.mxu0 %v3881_v16  ;;  %v2841_v16 = vld [vmem:[%s5958_s3 + $0xd30] sm:$0xff]  ;;  %v3935_v21 = vpack.c.bf16 %v2828_v14, %v2827_v13  ;;  %v2899_v14 = vld [vmem:[%s5958_s3 + $0xf00] sm:$0xff] }
 0x1a6   : > { %3884 = vmatprep.subr.bf16.mxu0 %v3883_v19  ;;  %v2859_v19 = vld [vmem:[%s5958_s3 + $0xdc0] sm:$0xff]  ;;  %v3965_v24 = vpack.c.bf16 %v2842_v17, %v2841_v16  ;;  %v2917_v17 = vld [vmem:[%s5958_s3 + $0xf90] sm:$0xff] }
 0x1a7   : > { %3914 = vmatpush3.bf16.msra.mxu1 %v3913_v22  ;;  %v2811_v22 = vld [vmem:[%s5958_s3 + $0xc40] sm:$0xff]  ;;  %v3967_v28 = vpack.c.bf16 %v2860_v20, %v2859_v19  ;;  %v1961_v19 = vrot.slane %v4576_v42, 4 }
 0x1a8   : > { %3916 = vmatprep.subr.bf16.mxu1 %v3915_v25  ;;  %v2829_v25 = vld [vmem:[%s5958_s3 + $0xcd0] sm:$0xff]  ;;  %v3937_v31 = vpack.c.bf16 %v2812_v0, %v2811_v22  ;;  %v2870_v22 = vld [vmem:[%s5958_s3 + $0xe18] sm:$0xff]  ;;  %v2178_v0 = vrot.slane %v4586_v47, 6  ;;  %v2891_v52 = vld [vmem:[%s5958_s3 + $0xec0] sm:$0xff] }
 0x1a9   : > { %3886 = vmatpush3.bf16.msra.mxu0 %v3885_v29  ;;  %v2843_v29 = vld [vmem:[%s5958_s3 + $0xd40] sm:$0xff]  ;;  %v3939_v34 = vpack.c.bf16 %v2830_v26, %v2829_v25  ;;  %v2888_v26 = vld [vmem:[%s5958_s3 + $0xea8] sm:$0xff] }
 0x1aa   : > { %3920 = vmatprep.subr.bf16.mxu0 %v3919_v32  ;;  %v2861_v32 = vld [vmem:[%s5958_s3 + $0xdd0] sm:$0xff]  ;;  %v3969_v37 = vpack.c.bf16 %v2844_v30, %v2843_v29  ;;  %v2887_v25 = vld [vmem:[%s5958_s3 + $0xea0] sm:$0xff] }
 0x1ab   : > { %3918 = vmatpush3.bf16.msra.mxu1 %v3917_v35  ;;  %v2813_v35 = vld [vmem:[%s5958_s3 + $0xc50] sm:$0xff]  ;;  %v3971_v40 = vpack.c.bf16 %v2862_v33, %v2861_v32  ;;  %v2286_v32 = vrot.slane %v4586_v47, 7  ;;  %v2872_v47 = vld [vmem:[%s5958_s3 + $0xe28] sm:$0xff] }
 0x1ac   : > { %1814 = vmatmul.mubr.f32.vlgmr.msra.gmra.mrb[18].mxu0 %v1745_v45  ;;  %3952 = vmatprep.subr.bf16.mxu1 %v3951_v38  ;;  %v2831_v38 = vld [vmem:[%s5958_s3 + $0xce0] sm:$0xff]  ;;  %v3941_v44 = vpack.c.bf16 %v2814_v36, %v2813_v35  ;;  %v2901_v30 = vld [vmem:[%s5958_s3 + $0xf10] sm:$0xff]  ;;  %v2920_v35 = vld [vmem:[%s5958_s3 + $0xfa8] sm:$0xff]  ;;  %v3991_v36 = vpack.c.bf16 %v2888_v26, %v2887_v25 }
 0x1ad   : > { %3922 = vmatpush3.bf16.msra.mxu0 %v3921_v41  ;;  %2029 = vmatprep.mubr.f32.mxu0 %v1962_v49  ;;  %v2845_v41 = vld [vmem:[%s5958_s3 + $0xd50] sm:$0xff]  ;;  %v2863_v45 = vld [vmem:[%s5958_s3 + $0xde0] sm:$0xff]  ;;  %v3943_v46 = vpack.c.bf16 %v2832_v39, %v2831_v38  ;;  %v2816_v49 = vld [vmem:[%s5958_s3 + $0xc68] sm:$0xff] }
 0x1ae   : > { %1922 = vmatmul.mubr.f32.vlgmr.msra.gmra.mrb[18].mxu1 %v1853_v53  ;;  %3924 = vmatprep.subr.bf16.mxu0 %v3923_v23  ;;  %v2864_v23 = vld [vmem:[%s5958_s3 + $0xde8] sm:$0xff]  ;;  %v3945_v56 = vpack.c.bf16 %v2816_v49, %v2815_v48  ;;  %v2889_v39 = vld [vmem:[%s5958_s3 + $0xeb0] sm:$0xff]  ;;  %v2898_v26 = vld [vmem:[%s5958_s3 + $0xef8] sm:$0xff] }
 0x1af   : > { %3954 = vmatpush3.bf16.msra.mxu1 %v3953_v50  ;;  %2137 = vmatprep.mubr.f32.mxu1 %v2070_v57  ;;  %v3973_v50 = vpack.c.bf16 %v2846_v43, %v2845_v41  ;;  %v3975_v53 = vpack.c.bf16 %v2864_v23, %v2863_v45  ;;  %v2865_v57 = vld [vmem:[%s5958_s3 + $0xdf0] sm:$0xff]  ;;  %v2903_v43 = vld [vmem:[%s5958_s3 + $0xf20] sm:$0xff] }
 0x1b0   : > { %3956 = vmatprep.subr.bf16.mxu1 %v3955_v54  ;;  %v2847_v54 = vld [vmem:[%s5958_s3 + $0xd60] sm:$0xff]  ;;  %v2921_v23 = vld [vmem:[%s5958_s3 + $0xfb0] sm:$0xff] }
 0x1b1   : > { %3926 = vmatpush3.bf16.msra.mxu0 %v3925_v58  ;;  %v2866_v58 = vld [vmem:[%s5958_s3 + $0xdf8] sm:$0xff]  ;;  %v3977_v62 = vpack.c.bf16 %v2848_v55, %v2847_v54  ;;  %v2873_v49 = vld [vmem:[%s5958_s3 + $0xe30] sm:$0xff] }
 0x1b2   : > { %3928 = vmatprep.subr.bf16.mxu0 %v3927_v61  ;;  %v2818_v61 = vld [vmem:[%s5958_s3 + $0xc78] sm:$0xff]  ;;  %v3979_v2 = vpack.c.bf16 %v2866_v58, %v2865_v57  ;;  %v2905_v55 = vld [vmem:[%s5958_s3 + $0xf30] sm:$0xff]  ;;  %v2923_v58 = vld [vmem:[%s5958_s3 + $0xfc0] sm:$0xff] }
 0x1b3   : > { %3958 = vmatpush3.bf16.msra.mxu1 %v3957_v1  ;;  %v2884_v1 = vld [vmem:[%s5958_s3 + $0xe88] sm:$0xff]  ;;  %v3949_v6 = vpack.c.bf16 %v2818_v61, %v2817_v60  ;;  %v2875_v61 = vld [vmem:[%s5958_s3 + $0xe40] sm:$0xff]  ;;  %v2897_v25 = vld [vmem:[%s5958_s3 + $0xef0] sm:$0xff] }
 0x1b4   : > { %3960 = vmatprep.subr.bf16.mxu1 %v3959_v5  ;;  %v2850_v5 = vld [vmem:[%s5958_s3 + $0xd78] sm:$0xff]  ;;  %v3983_v9 = vpack.c.bf16 %v2884_v1, %v2883_v63  ;;  %v2893_v1 = vld [vmem:[%s5958_s3 + $0xed0] sm:$0xff] }
 0x1b5   : > { %3930 = vmatpush3.bf16.msra.mxu0 %v3929_v8  ;;  %v2916_v8 = vld [vmem:[%s5958_s3 + $0xf88] sm:$0xff]  ;;  %v3981_v27 = vpack.c.bf16 %v2850_v5, %v2849_v3  ;;  %v2907_v5 = vld [vmem:[%s5958_s3 + $0xf40] sm:$0xff] }
 0x1b6   : > { %3932 = vmatprep.subr.bf16.mxu0 %v3931_v11  ;;  %v2868_v11 = vld [vmem:[%s5958_s3 + $0xe08] sm:$0xff]  ;;  %v4015_v13 = vpack.c.bf16 %v2916_v8, %v2915_v7  ;;  %v2925_v8 = vld [vmem:[%s5958_s3 + $0xfd0] sm:$0xff] }
 0x1b7   : > { %3962 = vmatpush3.bf16.msra.mxu1 %v3961_v12  ;;  %v2886_v12 = vld [vmem:[%s5958_s3 + $0xe98] sm:$0xff]  ;;  %v3985_v16 = vpack.c.bf16 %v2868_v11, %v2867_v10  ;;  %v2877_v11 = vld [vmem:[%s5958_s3 + $0xe50] sm:$0xff] }
 0x1b8   : > { %3964 = vmatprep.subr.bf16.mxu1 %v3963_v15  ;;  %v2900_v15 = vld [vmem:[%s5958_s3 + $0xf08] sm:$0xff]  ;;  %v3987_v20 = vpack.c.bf16 %v2886_v12, %v2885_v4  ;;  %v2895_v12 = vld [vmem:[%s5958_s3 + $0xee0] sm:$0xff] }
 0x1b9   : > { %3934 = vmatpush3.bf16.msra.mxu0 %v3933_v18  ;;  %v2918_v18 = vld [vmem:[%s5958_s3 + $0xf98] sm:$0xff] }
 0x1ba   : > { %3936 = vmatprep.subr.bf16.mxu0 %v3935_v21  ;;  %v2869_v21 = vld [vmem:[%s5958_s3 + $0xe10] sm:$0xff]  ;;  %v4019_v29 = vpack.c.bf16 %v2918_v18, %v2917_v17  ;;  %v2927_v18 = vld [vmem:[%s5958_s3 + $0xfe0] sm:$0xff] }
 0x1bb   : > { %3966 = vmatpush3.bf16.msra.mxu1 %v3965_v24  ;;  %v4017_v24 = vpack.c.bf16 %v2900_v15, %v2899_v14  ;;  %v3989_v33 = vpack.c.bf16 %v2870_v22, %v2869_v21  ;;  %v2909_v15 = vld [vmem:[%s5958_s3 + $0xf50] sm:$0xff]  ;;  %v2879_v21 = vld [vmem:[%s5958_s3 + $0xe60] sm:$0xff]  ;;  %v2880_v22 = vld [vmem:[%s5958_s3 + $0xe68] sm:$0xff] }
 0x1bc   : > { %3968 = vmatprep.subr.bf16.mxu1 %v3967_v28  ;;  %v2069_v28 = vrot.slane %v4576_v42, 5 }
 0x1bd   : > { %3938 = vmatpush3.bf16.msra.mxu0 %v3937_v31  ;;  %v2902_v31 = vld [vmem:[%s5958_s3 + $0xf18] sm:$0xff] }
 0x1be   : > { %3940 = vmatprep.subr.bf16.mxu0 %v3939_v34  ;;  %v2919_v34 = vld [vmem:[%s5958_s3 + $0xfa0] sm:$0xff]  ;;  %v4021_v38 = vpack.c.bf16 %v2902_v31, %v2901_v30 }
 0x1bf   : > { %3970 = vmatpush3.bf16.msra.mxu1 %v3969_v37  ;;  %v2871_v37 = vld [vmem:[%s5958_s3 + $0xe20] sm:$0xff]  ;;  %v4023_v41 = vpack.c.bf16 %v2920_v35, %v2919_v34  ;;  %v4009_v35 = vpack.c.bf16 %v2880_v22, %v2879_v21 }
 0x1c0   : > { %3972 = vmatprep.subr.bf16.mxu1 %v3971_v40  ;;  %v2890_v40 = vld [vmem:[%s5958_s3 + $0xeb8] sm:$0xff]  ;;  %v3993_v45 = vpack.c.bf16 %v2872_v47, %v2871_v37  ;;  %v2911_v31 = vld [vmem:[%s5958_s3 + $0xf60] sm:$0xff] }
 0x1c1   : > { %3942 = vmatpush3.bf16.msra.mxu0 %v3941_v44  ;;  %v2904_v44 = vld [vmem:[%s5958_s3 + $0xf28] sm:$0xff]  ;;  %v3995_v48 = vpack.c.bf16 %v2890_v40, %v2889_v39  ;;  %v2930_v37 = vld [vmem:[%s5958_s3 + $0xff8] sm:$0xff]  ;;  %v2881_v39 = vld [vmem:[%s5958_s3 + $0xe70] sm:$0xff] }
 0x1c2   : > { %3944 = vmatprep.subr.bf16.mxu0 %v3943_v46  ;;  %v2922_v46 = vld [vmem:[%s5958_s3 + $0xfb8] sm:$0xff]  ;;  %v4025_v51 = vpack.c.bf16 %v2904_v44, %v2903_v43 }
 0x1c3   : > { %3974 = vmatpush3.bf16.msra.mxu1 %v3973_v50  ;;  %v2874_v50 = vld [vmem:[%s5958_s3 + $0xe38] sm:$0xff]  ;;  %v4027_v54 = vpack.c.bf16 %v2922_v46, %v2921_v23  ;;  %v2913_v23 = vld [vmem:[%s5958_s3 + $0xf70] sm:$0xff] }
 0x1c4   : > { %3976 = vmatprep.subr.bf16.mxu1 %v3975_v53  ;;  %v2892_v53 = vld [vmem:[%s5958_s3 + $0xec8] sm:$0xff]  ;;  %v3997_v57 = vpack.c.bf16 %v2874_v50, %v2873_v49  ;;  %v2882_v40 = vld [vmem:[%s5958_s3 + $0xe78] sm:$0xff] }
 0x1c5   : > { %3946 = vmatpush3.bf16.msra.mxu0 %v3945_v56  ;;  %v2906_v56 = vld [vmem:[%s5958_s3 + $0xf38] sm:$0xff]  ;;  %v3999_v60 = vpack.c.bf16 %v2892_v53, %v2891_v52  ;;  %v4013_v49 = vpack.c.bf16 %v2882_v40, %v2881_v39  ;;  %v2285_v52 = vrot.slane %v4576_v42, 7 }
 0x1c6   : > { %3948 = vmatprep.subr.bf16.mxu0 %v3947_v59  ;;  %v2924_v59 = vld [vmem:[%s5958_s3 + $0xfc8] sm:$0xff]  ;;  %v4029_v63 = vpack.c.bf16 %v2906_v56, %v2905_v55  ;;  %v2914_v46 = vld [vmem:[%s5958_s3 + $0xf78] sm:$0xff] }
 0x1c7   : > { %3978 = vmatpush3.bf16.msra.mxu1 %v3977_v62  ;;  %v2876_v62 = vld [vmem:[%s5958_s3 + $0xe48] sm:$0xff]  ;;  %v4031_v3 = vpack.c.bf16 %v2924_v59, %v2923_v58  ;;  %v4045_v50 = vpack.c.bf16 %v2914_v46, %v2913_v23 }
 0x1c8   : > { %3980 = vmatprep.subr.bf16.mxu1 %v3979_v2  ;;  %v2894_v2 = vld [vmem:[%s5958_s3 + $0xed8] sm:$0xff]  ;;  %v4001_v7 = vpack.c.bf16 %v2876_v62, %v2875_v61 }
 0x1c9   : > { %3950 = vmatpush3.bf16.msra.mxu0 %v3949_v6  ;;  %v2908_v6 = vld [vmem:[%s5958_s3 + $0xf48] sm:$0xff]  ;;  %v4003_v10 = vpack.c.bf16 %v2894_v2, %v2893_v1 }
 0x1ca   : > { %3984 = vmatprep.subr.bf16.mxu0 %v3983_v9  ;;  %v2926_v9 = vld [vmem:[%s5958_s3 + $0xfd8] sm:$0xff]  ;;  %v4033_v4 = vpack.c.bf16 %v2908_v6, %v2907_v5 }
 0x1cb   : > { %3982 = vmatpush3.bf16.msra.mxu1 %v3981_v27  ;;  %v2878_v27 = vld [vmem:[%s5958_s3 + $0xe58] sm:$0xff]  ;;  %v4035_v14 = vpack.c.bf16 %v2926_v9, %v2925_v8 }
 0x1cc   : > { %2030 = vmatmul.mubr.f32.vlgmr.msra.gmra.mrb[20].mxu0 %v1961_v19  ;;  %4016 = vmatprep.subr.bf16.mxu1 %v4015_v13  ;;  %v2896_v13 = vld [vmem:[%s5958_s3 + $0xee8] sm:$0xff]  ;;  %v4005_v17 = vpack.c.bf16 %v2878_v27, %v2877_v11 }
 0x1cd   : > { %3986 = vmatpush3.bf16.msra.mxu0 %v3985_v16  ;;  %2245 = vmatprep.mubr.f32.mxu0 %v2178_v0  ;;  %v2910_v16 = vld [vmem:[%s5958_s3 + $0xf58] sm:$0xff]  ;;  %v2928_v19 = vld [vmem:[%s5958_s3 + $0xfe8] sm:$0xff] }
 0x1ce   : > { %2138 = vmatmul.mubr.f32.vlgmr.msra.gmra.mrb[20].mxu1 %v2069_v28  ;;  %3988 = vmatprep.subr.bf16.mxu0 %v3987_v20  ;;  %v4007_v20 = vpack.c.bf16 %v2896_v13, %v2895_v12  ;;  %v636_v28 = vld [vmem:[%s5959_s4] sm:$0x1]  ;;  %v4039_v30 = vpack.c.bf16 %v2928_v19, %v2927_v18 }
 0x1cf   : > { %4018 = vmatpush3.bf16.msra.mxu1 %v4017_v24  ;;  %2353 = vmatprep.mubr.f32.mxu1 %v2286_v32  ;;  %v4037_v24 = vpack.c.bf16 %v2910_v16, %v2909_v15  ;;  %v2912_v32 = vld [vmem:[%s5958_s3 + $0xf68] sm:$0xff] }
 0x1d0   : > { %4020 = vmatprep.subr.bf16.mxu1 %v4019_v29  ;;  %v4041_v44 = vpack.c.bf16 %v2912_v32, %v2911_v31 }
 0x1d1   : > { %3990 = vmatpush3.bf16.msra.mxu0 %v3989_v33 }
 0x1d2   : > { %3992 = vmatprep.subr.bf16.mxu0 %v3991_v36  ;;  %v2929_v36 = vld [vmem:[%s5958_s3 + $0xff0] sm:$0xff] }
 0x1d3   : > { %4022 = vmatpush3.bf16.msra.mxu1 %v4021_v38  ;;  %v4011_v38 = vpack.c.bf16 %v2898_v26, %v2897_v25 }
 0x1d4   : > { %4024 = vmatprep.subr.bf16.mxu1 %v4023_v41 }
 0x1d5   : > { %3994 = vmatpush3.bf16.msra.mxu0 %v3993_v45  ;;  %v4043_v45 = vpack.c.bf16 %v2930_v37, %v2929_v36 }
 0x1d6   : > { %3996 = vmatprep.subr.bf16.mxu0 %v3995_v48 }
 0x1d7   : > { %4026 = vmatpush3.bf16.msra.mxu1 %v4025_v51  ;;  %v2177_v51 = vrot.slane %v4576_v42, 6 }
 0x1d8   : > { %4028 = vmatprep.subr.bf16.mxu1 %v4027_v54 }
 0x1d9   : > { %3998 = vmatpush3.bf16.msra.mxu0 %v3997_v57 }
 0x1da   : > { %4000 = vmatprep.subr.bf16.mxu0 %v3999_v60 }
 0x1db   : > { %4030 = vmatpush3.bf16.msra.mxu1 %v4029_v63 }
 0x1dc   : > { %4032 = vmatprep.subr.bf16.mxu1 %v4031_v3 }
 0x1dd   : > { %4002 = vmatpush3.bf16.msra.mxu0 %v4001_v7 }
 0x1de   : > { %4004 = vmatprep.subr.bf16.mxu0 %v4003_v10 }
 0x1df   : > { %4034 = vmatpush3.bf16.msra.mxu1 %v4033_v4  ;;  %v2967_v0 = vpop.f32.mrb[8].mxu0 }
 0x1e0   : > { %v2968_v29 = vpop.f32.mrb[9].mxu0  ;;  %4036 = vmatprep.subr.bf16.mxu1 %v4035_v14 }
 0x1e1   : > { %v2969_v33 = vadd.f32 %v2968_v29, %v2967_v0  ;;  %4006 = vmatpush3.bf16.msra.mxu0 %v4005_v17  ;;  %v3002_v34 = vpop.f32.mrb[8].mxu1 }
 0x1e2   : > { %v3003_v47 = vpop.f32.mrb[9].mxu1  ;;  %4008 = vmatprep.subr.bf16.mxu0 %v4007_v20 }
 0x1e3   : > { %v739_v41 = vadd.f32 %v2969_v33, %v636_v28  ;;  %v3004_v43 = vadd.f32 %v3003_v47, %v3002_v34  ;;  %4038 = vmatpush3.bf16.msra.mxu1 %v4037_v24 }
 0x1e4   : > { %4040 = vmatprep.subr.bf16.mxu1 %v4039_v30 }
 0x1e5   : > { %v849_v48 = vadd.f32 %v3004_v43, %v739_v41  ;;  %4010 = vmatpush3.bf16.msra.mxu0 %v4009_v35 }
 0x1e6   : > { %4012 = vmatprep.subr.bf16.mxu0 %v4011_v38 }
 0x1e7   : > { %4042 = vmatpush3.bf16.msra.mxu1 %v4041_v44 }
 0x1e8   : > { %4044 = vmatprep.subr.bf16.mxu1 %v4043_v45 }
 0x1e9   : > { %4014 = vmatpush3.bf16.msra.mxu0 %v4013_v49 }
 0x1eb   : > { %4046 = vmatpush3.bf16.msra.mxu1 %v4045_v50 }
 0x1ec   : > { %2246 = vmatmul.mubr.f32.vlgmr.msra.gmra.mrb[22].mxu0 %v2177_v51 }
 0x1ee   : > { %2354 = vmatmul.mubr.f32.vlgmr.msra.gmra.mrb[22].mxu1 %v2285_v52 }
 0x1ff   : > { %v3037_v53 = vpop.f32.mrb[10].mxu0 }
 0x200   : > { %v3038_v54 = vpop.f32.mrb[11].mxu0 }
 0x201   : > { %v3039_v55 = vadd.f32 %v3038_v54, %v3037_v53  ;;  %v3072_v56 = vpop.f32.mrb[10].mxu1 }
 0x202   : > { %v3073_v57 = vpop.f32.mrb[11].mxu1 }
 0x203   : > { %v957_v58 = vadd.f32 %v3039_v55, %v849_v48  ;;  %v3074_v59 = vadd.f32 %v3073_v57, %v3072_v56 }
 0x205   : > { %v1065_v60 = vadd.f32 %v3074_v59, %v957_v58 }
 0x21f   : > { %v3107_v61 = vpop.f32.mrb[12].mxu0 }
 0x220   : > { %v3108_v62 = vpop.f32.mrb[13].mxu0 }
 0x221   : > { %v3109_v63 = vadd.f32 %v3108_v62, %v3107_v61  ;;  %v3142_v1 = vpop.f32.mrb[12].mxu1 }
 0x222   : > { %v3143_v2 = vpop.f32.mrb[13].mxu1 }
 0x223   : > { %v1173_v3 = vadd.f32 %v3109_v63, %v1065_v60  ;;  %v3144_v5 = vadd.f32 %v3143_v2, %v3142_v1 }
 0x225   : > { %v1281_v6 = vadd.f32 %v3144_v5, %v1173_v3 }
 0x23f   : > { %v3177_v7 = vpop.f32.mrb[14].mxu0 }
 0x240   : > { %v3178_v8 = vpop.f32.mrb[15].mxu0 }
 0x241   : > { %v3179_v42 = vadd.f32 %v3178_v8, %v3177_v7  ;;  %v3212_v9 = vpop.f32.mrb[14].mxu1 }
 0x242   : > { %v3213_v10 = vpop.f32.mrb[15].mxu1 }
 0x243   : > { %v1389_v11 = vadd.f32 %v3179_v42, %v1281_v6  ;;  %v3214_v27 = vadd.f32 %v3213_v10, %v3212_v9 }
 0x245   : > { %v1497_v4 = vadd.f32 %v3214_v27, %v1389_v11 }
 0x25f   : > { %v3247_v12 = vpop.f32.mrb[16].mxu0 }
 0x260   : > { %v3248_v13 = vpop.f32.mrb[17].mxu0 }
 0x261   : > { %v3249_v14 = vadd.f32 %v3248_v13, %v3247_v12  ;;  %v3282_v15 = vpop.f32.mrb[16].mxu1 }
 0x262   : > { %v3283_v16 = vpop.f32.mrb[17].mxu1 }
 0x263   : > { %v1601_v17 = vadd.f32 %v3249_v14, %v1497_v4  ;;  %v3284_v18 = vadd.f32 %v3283_v16, %v3282_v15 }
 0x265   : > { %v1711_v19 = vadd.f32 %v3284_v18, %v1601_v17 }
 0x27f   : > { %v3317_v20 = vpop.f32.mrb[18].mxu0 }
 0x280   : > { %v3318_v21 = vpop.f32.mrb[19].mxu0 }
 0x281   : > { %v3319_v22 = vadd.f32 %v3318_v21, %v3317_v20  ;;  %v3352_v0 = vpop.f32.mrb[18].mxu1 }
 0x282   : > { %v3353_v24 = vpop.f32.mrb[19].mxu1 }
 0x283   : > { %v1819_v25 = vadd.f32 %v3319_v22, %v1711_v19  ;;  %v3354_v26 = vadd.f32 %v3353_v24, %v3352_v0 }
 0x285   : > { %v1927_v28 = vadd.f32 %v3354_v26, %v1819_v25 }
 0x29f   : > { %v3387_v29 = vpop.f32.mrb[20].mxu0 }
 0x2a0   : > { %v3388_v30 = vpop.f32.mrb[21].mxu0 }
 0x2a1   : > { %v3389_v31 = vadd.f32 %v3388_v30, %v3387_v29  ;;  %v3422_v32 = vpop.f32.mrb[20].mxu1 }
 0x2a2   : > { %v3423_v33 = vpop.f32.mrb[21].mxu1 }
 0x2a3   : > { %v2035_v34 = vadd.f32 %v3389_v31, %v1927_v28  ;;  %v3424_v35 = vadd.f32 %v3423_v33, %v3422_v32 }
 0x2a5   : > { %v2143_v36 = vadd.f32 %v3424_v35, %v2035_v34 }
 0x2bf   : > { %v3457_v37 = vpop.f32.mrb[22].mxu0 }
 0x2c0   : > { %v3458_v47 = vpop.f32.mrb[23].mxu0 }
 0x2c1   : > { %v3459_v38 = vadd.f32 %v3458_v47, %v3457_v37  ;;  %v3492_v39 = vpop.f32.mrb[22].mxu1 }
 0x2c2   : > { %v3493_v40 = vpop.f32.mrb[23].mxu1 }
 0x2c3   : > { %v2251_v41 = vadd.f32 %v3459_v38, %v2143_v36  ;;  %v3494_v43 = vadd.f32 %v3493_v40, %v3492_v39 }
 0x2c5   : > { %v2359_v44 = vadd.f32 %v3494_v43, %v2251_v41 }
 0x2c7   : > { %2360 = vst [vmem:[%s216_s6] sm:$0x1] %v2359_v44 }
 0x2c8   : > { %4103 = shalt.err (!%p4100_p3)
}
 0x2c9   : > { %s4104_s15 = scalar_lea.hbm %s5913_s10, 16  ;;  %s4108_s23 = scalar_lea.hbm %s5960_s5, 32 }
 0x2ca   : > { %p4105_p4 = scmp.ne.s32.totalorder %s5913_s10, %s4104_s15  ;;  %p4109_p9 = scmp.lt.u32.totalorder %s5913_s10, %s5960_s5 }
 0x2cb   : > { %p4110_p10 = scmp.lt.u32.totalorder %s4108_s23, %s4104_s15  ;;  %p4112_p12 = scmp.lt.u32.totalorder %s4104_s15, %s5913_s10 }
 0x2cc   : > { %p4106_p7 = pnand %p4105_p4, %p4226_p5 }
 0x2cd   : > { %p4111_p11 = por %p4110_p10, %p4109_p9 }
 0x2ce   : > { %p4107_p8 = pneg %p4106_p7 }
 0x2cf   : > { %p4113_p13 = por %p4112_p12, %p4111_p11 }
 0x2d1   : > { %p4114_p0 = pnand %p4113_p13, %p4107_p8 }
 0x2d3   : > { %4117 = shalt.err (!%p4114_p0)
}
 0x2d4   : > { %4047 = dma.vmem_to_hbm [thread:$0]  (%p4226_p5), %s5915_s7, 16, %s5913_s10, %s2362_s11  }
 0x2d5 PF: > { %p4053_p1 = scmp.ge.s32.totalorder %s4152_s21, 2  ;;  %s2386_s30 = sand.u32 1, %s4140_s18  }
 0x2d6   : > { %s2387_s6 = scalar_lea.sflag [#allocation3], %s2386_s30 }
 0x2d7   : > { %p4050_p2 = pnand %p4053_p1, %p4230_p6 }
 0x2d9   : > { %4135 = dma.done.wait (!%p4050_p2), %s2387_s6, 16  }
 0x2da   : > { %4137 = vsyncadd (!%p4050_p2), %s2387_s6, 4294967280  ;;  %p15_p3 = scmp.ge.s32.totalorder %s4213_s24, 4   ;;  %s5965_s18 = smov %s4144_s19 }
 0x2db   : > { %s5966_s19 = smov %s4148_s20  ;;  %s5967_s20 = smov %s4224_s27 }
 0x2dc   : > { %s5968_s21 = smov %s4213_s24  ;;  %17 = sbr.rel (!%p15_p3) target bundleno = 3 (0x3), region = 90 }
 0x2e3   :  { %2391 = vsyncpa [#allocation3], 1 }
 0x2e4   :  { %2393 = vsyncpa [#allocation3 + $0x1], 1 }

</bundles_post_ra>
